<compile_context>
chip_gen: v5e
topology: v5e:2x2
jax: 0.10.0
libtpu: 0.0.40
codegen_flags: <defaults>
</compile_context>

<pallas_src>
import functools

import jax
import jax.numpy as jnp
from jax.experimental import pallas as pl
from jax.experimental.pallas import tpu as pltpu

HIDDEN = 32
OUT_CLASSES = 3
GPAD = 128       # 3 * HIDDEN = 96, padded to one full lane width
OUT_PAD = 128    # lane-dense logits block; sliced to OUT_CLASSES in the wrapper


def _round_up(x, m):
    return (x + m - 1) // m * m


def _pad_cols(a, target):
    return jnp.pad(a, [(0, 0)] * (a.ndim - 1) + [(0, target - a.shape[-1])])


def hitnet_kernel(
    x_ref,                                     # (T, TILE_B, D) time-major input tile
    we_ref, be_ref,                            # embedding: (D, H), (1, H)
    wih0_ref, whh0_ref, bih0_ref, bhh0_ref,    # GRU L0: (H,GPAD),(H,GPAD),(1,GPAD),(1,GPAD)
    wih1_ref, whh1_ref, bih1_ref, bhh1_ref,    # GRU L1: same shapes
    wo_ref, bo_ref,                            # head: (H, OUT_PAD), (1, OUT_PAD)
    out_ref,                                   # (TILE_B, OUT_PAD)
    gi_ref,                                    # VMEM scratch (T, TILE_B, GPAD)
    seq_ref,                                   # VMEM scratch (T, TILE_B, H)
):
    T, TB, D = x_ref.shape
    H = HIDDEN

    # ---- embedding: Linear(D, H) + ReLU, all timesteps in one matmul --------
    x = x_ref[...].astype(jnp.float32).reshape(T * TB, D)
    emb = jnp.dot(x, we_ref[...], preferred_element_type=jnp.float32) + be_ref[...]
    emb = jnp.maximum(emb, 0.0)                                   # (T*TB, H)

    # ---- GRU step (PyTorch gate order [r | z | n]); gi precomputed per layer
    def make_step(whh, bhh, seq_out):
        def step(t, h):
            gi = gi_ref[t]                                        # (TB, GPAD)
            gh = jnp.dot(h, whh, preferred_element_type=jnp.float32) + bhh
            r = jax.nn.sigmoid(gi[:, :H] + gh[:, :H])
            z = jax.nn.sigmoid(gi[:, H:2 * H] + gh[:, H:2 * H])
            n = jnp.tanh(gi[:, 2 * H:3 * H] + r * gh[:, 2 * H:3 * H])
            h = (1.0 - z) * n + z * h
            if seq_out is not None:
                seq_out[t] = h
            return h
        return step

    h0 = jnp.zeros((TB, H), jnp.float32)

    # ---- layer 0: hoisted input-to-hidden projection, then recurrence -------
    gi_ref[...] = (
        jnp.dot(emb, wih0_ref[...], preferred_element_type=jnp.float32)
        + bih0_ref[...]
    ).reshape(T, TB, GPAD)
    jax.lax.fori_loop(0, T, make_step(whh0_ref[...], bhh0_ref[...], seq_ref),
                      h0, unroll=True)

    # ---- layer 1: hoisted projection over layer-0 sequence, keep last h -----
    gi_ref[...] = (
        jnp.dot(seq_ref[...].reshape(T * TB, H), wih1_ref[...],
                preferred_element_type=jnp.float32)
        + bih1_ref[...]
    ).reshape(T, TB, GPAD)
    h_last = jax.lax.fori_loop(0, T, make_step(whh1_ref[...], bhh1_ref[...], None),
                               h0, unroll=True)

    # ---- dropout (eval mode -> identity) + output head, lane-dense store ----
    out_ref[...] = (
        jnp.dot(h_last, wo_ref[...], preferred_element_type=jnp.float32)
        + bo_ref[...]
    ).astype(out_ref.dtype)


def _vmem_limit_bytes(tile_b, T, D):
    f32 = 4
    H = HIDDEN
    x_tile = 2 * T * tile_b * D * f32                       # double-buffered input
    out_tile = 2 * tile_b * OUT_PAD * f32                   # double-buffered output
    weights = 2 * (D * H + H + 2 * (2 * H * GPAD + 2 * GPAD)
                   + H * OUT_PAD + OUT_PAD) * f32
    scratch = (T * tile_b * GPAD + T * tile_b * H) * f32
    live = 4 * T * tile_b * GPAD * f32                      # intermediates headroom
    est = x_tile + out_tile + weights + scratch + live + (4 << 20)
    # stay within v7x's smaller physical VMEM (64 MiB); default scoped is 16-32 MiB
    return int(min(64 << 20, max(32 << 20, est)))


@functools.partial(jax.jit, static_argnames=("tile_b",))
def hitnet_forward(x, params, *, tile_b=128):
    """x: (B, T, D) float32; params: dict of pre-transposed weights.

    tile_b: batch tile size (use 128 on v5e, 256 on v6e/v7x for large batches).
    """
    B, T, D = x.shape
    H = HIDDEN

    tile_b = min(tile_b, _round_up(B, 8))
    b_pad = _round_up(B, tile_b)

    # Time-major layout so the kernel flattens to (T*TILE_B, .) without an
    # in-kernel transpose; pad batch up to a whole number of tiles.
    xt = jnp.transpose(x, (1, 0, 2)).astype(jnp.float32)     # (T, B, D)
    if b_pad != B:
        xt = jnp.pad(xt, ((0, 0), (0, b_pad - B), (0, 0)))

    def prep_gru(wih, whh, bih, bhh):
        # Fold r/z hidden biases into the input biases; n-gate bias must stay
        # split (PyTorch: n = tanh(x@W_in + b_in + r * (h@W_hn + b_hn))).
        bih_eff = bih.at[:, :2 * H].add(bhh[:, :2 * H])
        bhh_eff = bhh.at[:, :2 * H].set(0.0)
        return (_pad_cols(wih, GPAD), _pad_cols(whh, GPAD),
                _pad_cols(bih_eff, GPAD), _pad_cols(bhh_eff, GPAD))

    wih0, whh0, bih0, bhh0 = prep_gru(params["wih0"], params["whh0"],
                                      params["bih0"], params["bhh0"])
    wih1, whh1, bih1, bhh1 = prep_gru(params["wih1"], params["whh1"],
                                      params["bih1"], params["bhh1"])
    wo = _pad_cols(params["wo"], OUT_PAD)
    bo = _pad_cols(params["bo"], OUT_PAD)

    args = (xt, params["we"], params["be"],
            wih0, whh0, bih0, bhh0,
            wih1, whh1, bih1, bhh1,
            wo, bo)

    # x/out tiles walk the batch axis; weights/biases (all 2-D) use a constant
    # index_map so they are fetched once and stay VMEM-resident across steps.
    x_spec = pl.BlockSpec((T, tile_b, D), lambda b: (0, b, 0))
    w_specs = [pl.BlockSpec(a.shape, lambda b: (0, 0)) for a in args[1:]]
    out_spec = pl.BlockSpec((tile_b, OUT_PAD), lambda b: (b, 0))

    grid_spec = pltpu.PrefetchScalarGridSpec(
        num_scalar_prefetch=0,
        grid=(b_pad // tile_b,),
        in_specs=[x_spec] + w_specs,
        out_specs=out_spec,
        scratch_shapes=[
            pltpu.VMEM((T, tile_b, GPAD), jnp.float32),    # hoisted gate projections
            pltpu.VMEM((T, tile_b, HIDDEN), jnp.float32),  # layer-0 output sequence
        ],
    )

    out = pl.pallas_call(
        hitnet_kernel,
        out_shape=jax.ShapeDtypeStruct((b_pad, OUT_PAD), jnp.float32),
        grid_spec=grid_spec,
        compiler_params=pltpu.CompilerParams(
            dimension_semantics=("parallel",),
            vmem_limit_bytes=_vmem_limit_bytes(tile_b, T, D),
        ),
    )(*args)

    return out[:B, :OUT_CLASSES]


def init_params(key, input_size, hidden=HIDDEN, out_classes=OUT_CLASSES):
    """Deterministic synthetic parameters (shapes match nn.Module __init__)."""
    ks = jax.random.split(key, 12)
    s = 0.1

    def u(k, shape):
        return jax.random.uniform(k, shape, jnp.float32, -s, s)

    return {
        # embedding Linear(input_size, 32): torch weight (32, D) -> stored (D, 32)
        "we": u(ks[0], (input_size, hidden)),
        "be": u(ks[1], (1, hidden)),
        # GRU layer 0: weight_ih_l0 (3H, 32) -> (32, 3H); weight_hh_l0 (3H, H) -> (H, 3H)
        "wih0": u(ks[2], (hidden, 3 * hidden)),
        "whh0": u(ks[3], (hidden, 3 * hidden)),
        "bih0": u(ks[4], (1, 3 * hidden)),
        "bhh0": u(ks[5], (1, 3 * hidden)),
        # GRU layer 1: weight_ih_l1 (3H, H) -> (H, 3H)
        "wih1": u(ks[6], (hidden, 3 * hidden)),
        "whh1": u(ks[7], (hidden, 3 * hidden)),
        "bih1": u(ks[8], (1, 3 * hidden)),
        "bhh1": u(ks[9], (1, 3 * hidden)),
        # output Linear(32, 3): torch weight (3, 32) -> stored (32, 3)
        "wo": u(ks[10], (hidden, out_classes)),
        "bo": u(ks[11], (1, out_classes)),
    }


if __name__ == "__main__":
    B, T, D = 2, 8, 16  # batch, sequence length, input_size
    key = jax.random.PRNGKey(0)
    kx, kp = jax.random.split(key)
    x = jax.random.normal(kx, (B, T, D), jnp.float32)
    params = init_params(kp, input_size=D)

    out = hitnet_forward(x, params)
    out = jax.block_until_ready(out)
    assert out.shape == (B, OUT_CLASSES) and out.dtype == jnp.float32
    print("KERNEL_OK")
</pallas_src>

<mosaic_0001>
module attributes {stable_mosaic.version = 11 : i64} {
  func.func @hitnet_kernel(%arg0: i32, %arg1: memref<8x8x16xf32, #tpu.memory_space<vmem>>, %arg2: memref<16x32xf32, #tpu.memory_space<vmem>>, %arg3: memref<1x32xf32, #tpu.memory_space<vmem>>, %arg4: memref<32x128xf32, #tpu.memory_space<vmem>>, %arg5: memref<32x128xf32, #tpu.memory_space<vmem>>, %arg6: memref<1x128xf32, #tpu.memory_space<vmem>>, %arg7: memref<1x128xf32, #tpu.memory_space<vmem>>, %arg8: memref<32x128xf32, #tpu.memory_space<vmem>>, %arg9: memref<32x128xf32, #tpu.memory_space<vmem>>, %arg10: memref<1x128xf32, #tpu.memory_space<vmem>>, %arg11: memref<1x128xf32, #tpu.memory_space<vmem>>, %arg12: memref<32x128xf32, #tpu.memory_space<vmem>>, %arg13: memref<1x128xf32, #tpu.memory_space<vmem>>, %arg14: memref<8x128xf32, #tpu.memory_space<vmem>>, %arg15: memref<8x8x128xf32, #tpu.memory_space<vmem>>, %arg16: memref<8x8x32xf32, #tpu.memory_space<vmem>>) attributes {dimension_semantics = [#tpu.dimension_semantics<parallel>], iteration_bounds = array<i64: 1>, scalar_prefetch = 0 : i64, scratch_operands = 2 : i64, tpu.core_type = #tpu.core_type<tc>, window_params = [{transform_indices = @transform_0, window_bounds = array<i64: 8, 8, 16>}, {pipeline_mode = #tpu.pipeline_mode<synchronous>, transform_indices = @transform_1, window_bounds = array<i64: 16, 32>}, {pipeline_mode = #tpu.pipeline_mode<synchronous>, transform_indices = @transform_2, window_bounds = array<i64: 1, 32>}, {pipeline_mode = #tpu.pipeline_mode<synchronous>, transform_indices = @transform_3, window_bounds = array<i64: 32, 128>}, {pipeline_mode = #tpu.pipeline_mode<synchronous>, transform_indices = @transform_4, window_bounds = array<i64: 32, 128>}, {pipeline_mode = #tpu.pipeline_mode<synchronous>, transform_indices = @transform_5, window_bounds = array<i64: 1, 128>}, {pipeline_mode = #tpu.pipeline_mode<synchronous>, transform_indices = @transform_6, window_bounds = array<i64: 1, 128>}, {pipeline_mode = #tpu.pipeline_mode<synchronous>, transform_indices = @transform_7, window_bounds = array<i64: 32, 128>}, {pipeline_mode = #tpu.pipeline_mode<synchronous>, transform_indices = @transform_8, window_bounds = array<i64: 32, 128>}, {pipeline_mode = #tpu.pipeline_mode<synchronous>, transform_indices = @transform_9, window_bounds = array<i64: 1, 128>}, {pipeline_mode = #tpu.pipeline_mode<synchronous>, transform_indices = @transform_10, window_bounds = array<i64: 1, 128>}, {pipeline_mode = #tpu.pipeline_mode<synchronous>, transform_indices = @transform_11, window_bounds = array<i64: 32, 128>}, {pipeline_mode = #tpu.pipeline_mode<synchronous>, transform_indices = @transform_12, window_bounds = array<i64: 1, 128>}, {transform_indices = @transform_13, window_bounds = array<i64: 8, 128>}]} {
    %c0 = arith.constant 0 : index
    %c0_0 = arith.constant 0 : index
    %c0_1 = arith.constant 0 : index
    %0 = vector.load %arg1[%c0, %c0_0, %c0_1] : memref<8x8x16xf32, #tpu.memory_space<vmem>>, vector<8x8x16xf32>
    %1 = vector.shape_cast %0 : vector<8x8x16xf32> to vector<64x16xf32>
    %c0_2 = arith.constant 0 : index
    %c0_3 = arith.constant 0 : index
    %2 = vector.load %arg2[%c0_2, %c0_3] : memref<16x32xf32, #tpu.memory_space<vmem>>, vector<16x32xf32>
    %cst = arith.constant dense<0.000000e+00> : vector<64x32xf32>
    %3 = tpu.matmul %1, %2, %cst {dimension_numbers = #tpu.dot_dimension_numbers<[1], [0], [0], [1], [0, 0, 1, 1], [], []>} : vector<64x16xf32>, vector<16x32xf32>, vector<64x32xf32> -> vector<64x32xf32>
    %c0_4 = arith.constant 0 : index
    %c0_5 = arith.constant 0 : index
    %4 = vector.load %arg3[%c0_4, %c0_5] : memref<1x32xf32, #tpu.memory_space<vmem>>, vector<1x32xf32>
    %5 = vector.broadcast %4 : vector<1x32xf32> to vector<64x32xf32>
    %6 = arith.addf %3, %5 : vector<64x32xf32>
    %cst_6 = arith.constant 0.000000e+00 : f32
    %7 = vector.broadcast %cst_6 : f32 to vector<64x32xf32>
    %8 = arith.maximumf %6, %7 : vector<64x32xf32>
    %cst_7 = arith.constant 0.000000e+00 : f32
    %9 = vector.broadcast %cst_7 : f32 to vector<8x32xf32>
    %c0_8 = arith.constant 0 : index
    %c0_9 = arith.constant 0 : index
    %10 = vector.load %arg4[%c0_8, %c0_9] : memref<32x128xf32, #tpu.memory_space<vmem>>, vector<32x128xf32>
    %cst_10 = arith.constant dense<0.000000e+00> : vector<64x128xf32>
    %11 = tpu.matmul %8, %10, %cst_10 {dimension_numbers = #tpu.dot_dimension_numbers<[1], [0], [0], [1], [0, 0, 1, 1], [], []>} : vector<64x32xf32>, vector<32x128xf32>, vector<64x128xf32> -> vector<64x128xf32>
    %c0_11 = arith.constant 0 : index
    %c0_12 = arith.constant 0 : index
    %12 = vector.load %arg6[%c0_11, %c0_12] : memref<1x128xf32, #tpu.memory_space<vmem>>, vector<1x128xf32>
    %13 = vector.broadcast %12 : vector<1x128xf32> to vector<64x128xf32>
    %14 = arith.addf %11, %13 : vector<64x128xf32>
    %15 = vector.shape_cast %14 : vector<64x128xf32> to vector<8x8x128xf32>
    %c0_13 = arith.constant 0 : index
    %c0_14 = arith.constant 0 : index
    %c0_15 = arith.constant 0 : index
    %16 = vector.load %arg15[%c0_13, %c0_14, %c0_15] : memref<8x8x128xf32, #tpu.memory_space<vmem>>, vector<8x8x128xf32>
    tpu.vector_store %arg15[%c0_13, %c0_14, %c0_15], %15 {strides = array<i32>} : memref<8x8x128xf32, #tpu.memory_space<vmem>>, vector<8x8x128xf32>,
    %c0_16 = arith.constant 0 : index
    %c0_17 = arith.constant 0 : index
    %17 = vector.load %arg5[%c0_16, %c0_17] : memref<32x128xf32, #tpu.memory_space<vmem>>, vector<32x128xf32>
    %c0_18 = arith.constant 0 : index
    %c0_19 = arith.constant 0 : index
    %18 = vector.load %arg7[%c0_18, %c0_19] : memref<1x128xf32, #tpu.memory_space<vmem>>, vector<1x128xf32>
    %c0_i32 = arith.constant 0 : i32
    %19 = arith.index_cast %c0_i32 : i32 to index
    %c0_20 = arith.constant 0 : index
    %c0_21 = arith.constant 0 : index
    %20 = vector.load %arg15[%19, %c0_20, %c0_21] : memref<8x8x128xf32, #tpu.memory_space<vmem>>, vector<1x8x128xf32>
    %21 = vector.shape_cast %20 : vector<1x8x128xf32> to vector<8x128xf32>
    %cst_22 = arith.constant dense<0.000000e+00> : vector<8x128xf32>
    %22 = tpu.matmul %9, %17, %cst_22 {dimension_numbers = #tpu.dot_dimension_numbers<[1], [0], [0], [1], [0, 0, 1, 1], [], []>} : vector<8x32xf32>, vector<32x128xf32>, vector<8x128xf32> -> vector<8x128xf32>
    %23 = vector.broadcast %18 : vector<1x128xf32> to vector<8x128xf32>
    %24 = arith.addf %22, %23 : vector<8x128xf32>
    %25 = vector.extract_strided_slice %21 {offsets = [0, 0], sizes = [8, 32], strides = [1, 1]} : vector<8x128xf32> to vector<8x32xf32>
    %26 = vector.extract_strided_slice %24 {offsets = [0, 0], sizes = [8, 32], strides = [1, 1]} : vector<8x128xf32> to vector<8x32xf32>
    %27 = arith.addf %25, %26 : vector<8x32xf32>
    %28 = arith.negf %27 : vector<8x32xf32>
    %29 = math.exp %28 : vector<8x32xf32>
    %cst_23 = arith.constant 1.000000e+00 : f32
    %30 = vector.broadcast %cst_23 : f32 to vector<8x32xf32>
    %31 = arith.addf %30, %29 : vector<8x32xf32>
    %32 = arith.divf %30, %31 : vector<8x32xf32>
    %33 = vector.extract_strided_slice %21 {offsets = [0, 32], sizes = [8, 32], strides = [1, 1]} : vector<8x128xf32> to vector<8x32xf32>
    %34 = vector.extract_strided_slice %24 {offsets = [0, 32], sizes = [8, 32], strides = [1, 1]} : vector<8x128xf32> to vector<8x32xf32>
    %35 = arith.addf %33, %34 : vector<8x32xf32>
    %36 = arith.negf %35 : vector<8x32xf32>
    %37 = math.exp %36 : vector<8x32xf32>
    %cst_24 = arith.constant 1.000000e+00 : f32
    %38 = vector.broadcast %cst_24 : f32 to vector<8x32xf32>
    %39 = arith.addf %38, %37 : vector<8x32xf32>
    %40 = arith.divf %38, %39 : vector<8x32xf32>
    %41 = vector.extract_strided_slice %21 {offsets = [0, 64], sizes = [8, 32], strides = [1, 1]} : vector<8x128xf32> to vector<8x32xf32>
    %42 = vector.extract_strided_slice %24 {offsets = [0, 64], sizes = [8, 32], strides = [1, 1]} : vector<8x128xf32> to vector<8x32xf32>
    %43 = arith.mulf %32, %42 : vector<8x32xf32>
    %44 = arith.addf %41, %43 : vector<8x32xf32>
    %45 = math.tanh %44 : vector<8x32xf32>
    %cst_25 = arith.constant 1.000000e+00 : f32
    %46 = vector.broadcast %cst_25 : f32 to vector<8x32xf32>
    %47 = arith.subf %46, %40 : vector<8x32xf32>
    %48 = arith.mulf %47, %45 : vector<8x32xf32>
    %49 = arith.mulf %40, %9 : vector<8x32xf32>
    %50 = arith.addf %48, %49 : vector<8x32xf32>
    %51 = arith.index_cast %c0_i32 : i32 to index
    %c0_26 = arith.constant 0 : index
    %c0_27 = arith.constant 0 : index
    %52 = vector.load %arg16[%51, %c0_26, %c0_27] : memref<8x8x32xf32, #tpu.memory_space<vmem>>, vector<1x8x32xf32>
    %53 = vector.shape_cast %52 : vector<1x8x32xf32> to vector<8x32xf32>
    %54 = vector.shape_cast %50 : vector<8x32xf32> to vector<1x8x32xf32>
    tpu.vector_store %arg16[%51, %c0_26, %c0_27], %54 {strides = array<i32>} : memref<8x8x32xf32, #tpu.memory_space<vmem>>, vector<1x8x32xf32>,
    %c1_i32 = arith.constant 1 : i32
    %55 = arith.index_cast %c1_i32 : i32 to index
    %c0_28 = arith.constant 0 : index
    %c0_29 = arith.constant 0 : index
    %56 = vector.load %arg15[%55, %c0_28, %c0_29] : memref<8x8x128xf32, #tpu.memory_space<vmem>>, vector<1x8x128xf32>
    %57 = vector.shape_cast %56 : vector<1x8x128xf32> to vector<8x128xf32>
    %cst_30 = arith.constant dense<0.000000e+00> : vector<8x128xf32>
    %58 = tpu.matmul %50, %17, %cst_30 {dimension_numbers = #tpu.dot_dimension_numbers<[1], [0], [0], [1], [0, 0, 1, 1], [], []>} : vector<8x32xf32>, vector<32x128xf32>, vector<8x128xf32> -> vector<8x128xf32>
    %59 = vector.broadcast %18 : vector<1x128xf32> to vector<8x128xf32>
    %60 = arith.addf %58, %59 : vector<8x128xf32>
    %61 = vector.extract_strided_slice %57 {offsets = [0, 0], sizes = [8, 32], strides = [1, 1]} : vector<8x128xf32> to vector<8x32xf32>
    %62 = vector.extract_strided_slice %60 {offsets = [0, 0], sizes = [8, 32], strides = [1, 1]} : vector<8x128xf32> to vector<8x32xf32>
    %63 = arith.addf %61, %62 : vector<8x32xf32>
    %64 = arith.negf %63 : vector<8x32xf32>
    %65 = math.exp %64 : vector<8x32xf32>
    %cst_31 = arith.constant 1.000000e+00 : f32
    %66 = vector.broadcast %cst_31 : f32 to vector<8x32xf32>
    %67 = arith.addf %66, %65 : vector<8x32xf32>
    %68 = arith.divf %66, %67 : vector<8x32xf32>
    %69 = vector.extract_strided_slice %57 {offsets = [0, 32], sizes = [8, 32], strides = [1, 1]} : vector<8x128xf32> to vector<8x32xf32>
    %70 = vector.extract_strided_slice %60 {offsets = [0, 32], sizes = [8, 32], strides = [1, 1]} : vector<8x128xf32> to vector<8x32xf32>
    %71 = arith.addf %69, %70 : vector<8x32xf32>
    %72 = arith.negf %71 : vector<8x32xf32>
    %73 = math.exp %72 : vector<8x32xf32>
    %cst_32 = arith.constant 1.000000e+00 : f32
    %74 = vector.broadcast %cst_32 : f32 to vector<8x32xf32>
    %75 = arith.addf %74, %73 : vector<8x32xf32>
    %76 = arith.divf %74, %75 : vector<8x32xf32>
    %77 = vector.extract_strided_slice %57 {offsets = [0, 64], sizes = [8, 32], strides = [1, 1]} : vector<8x128xf32> to vector<8x32xf32>
    %78 = vector.extract_strided_slice %60 {offsets = [0, 64], sizes = [8, 32], strides = [1, 1]} : vector<8x128xf32> to vector<8x32xf32>
    %79 = arith.mulf %68, %78 : vector<8x32xf32>
    %80 = arith.addf %77, %79 : vector<8x32xf32>
    %81 = math.tanh %80 : vector<8x32xf32>
    %cst_33 = arith.constant 1.000000e+00 : f32
    %82 = vector.broadcast %cst_33 : f32 to vector<8x32xf32>
    %83 = arith.subf %82, %76 : vector<8x32xf32>
    %84 = arith.mulf %83, %81 : vector<8x32xf32>
    %85 = arith.mulf %76, %50 : vector<8x32xf32>
    %86 = arith.addf %84, %85 : vector<8x32xf32>
    %87 = arith.index_cast %c1_i32 : i32 to index
    %c0_34 = arith.constant 0 : index
    %c0_35 = arith.constant 0 : index
    %88 = vector.load %arg16[%87, %c0_34, %c0_35] : memref<8x8x32xf32, #tpu.memory_space<vmem>>, vector<1x8x32xf32>
    %89 = vector.shape_cast %88 : vector<1x8x32xf32> to vector<8x32xf32>
    %90 = vector.shape_cast %86 : vector<8x32xf32> to vector<1x8x32xf32>
    tpu.vector_store %arg16[%87, %c0_34, %c0_35], %90 {strides = array<i32>} : memref<8x8x32xf32, #tpu.memory_space<vmem>>, vector<1x8x32xf32>,
    %c2_i32 = arith.constant 2 : i32
    %91 = arith.index_cast %c2_i32 : i32 to index
    %c0_36 = arith.constant 0 : index
    %c0_37 = arith.constant 0 : index
    %92 = vector.load %arg15[%91, %c0_36, %c0_37] : memref<8x8x128xf32, #tpu.memory_space<vmem>>, vector<1x8x128xf32>
    %93 = vector.shape_cast %92 : vector<1x8x128xf32> to vector<8x128xf32>
    %cst_38 = arith.constant dense<0.000000e+00> : vector<8x128xf32>
    %94 = tpu.matmul %86, %17, %cst_38 {dimension_numbers = #tpu.dot_dimension_numbers<[1], [0], [0], [1], [0, 0, 1, 1], [], []>} : vector<8x32xf32>, vector<32x128xf32>, vector<8x128xf32> -> vector<8x128xf32>
    %95 = vector.broadcast %18 : vector<1x128xf32> to vector<8x128xf32>
    %96 = arith.addf %94, %95 : vector<8x128xf32>
    %97 = vector.extract_strided_slice %93 {offsets = [0, 0], sizes = [8, 32], strides = [1, 1]} : vector<8x128xf32> to vector<8x32xf32>
    %98 = vector.extract_strided_slice %96 {offsets = [0, 0], sizes = [8, 32], strides = [1, 1]} : vector<8x128xf32> to vector<8x32xf32>
    %99 = arith.addf %97, %98 : vector<8x32xf32>
    %100 = arith.negf %99 : vector<8x32xf32>
    %101 = math.exp %100 : vector<8x32xf32>
    %cst_39 = arith.constant 1.000000e+00 : f32
    %102 = vector.broadcast %cst_39 : f32 to vector<8x32xf32>
    %103 = arith.addf %102, %101 : vector<8x32xf32>
    %104 = arith.divf %102, %103 : vector<8x32xf32>
    %105 = vector.extract_strided_slice %93 {offsets = [0, 32], sizes = [8, 32], strides = [1, 1]} : vector<8x128xf32> to vector<8x32xf32>
    %106 = vector.extract_strided_slice %96 {offsets = [0, 32], sizes = [8, 32], strides = [1, 1]} : vector<8x128xf32> to vector<8x32xf32>
    %107 = arith.addf %105, %106 : vector<8x32xf32>
    %108 = arith.negf %107 : vector<8x32xf32>
    %109 = math.exp %108 : vector<8x32xf32>
    %cst_40 = arith.constant 1.000000e+00 : f32
    %110 = vector.broadcast %cst_40 : f32 to vector<8x32xf32>
    %111 = arith.addf %110, %109 : vector<8x32xf32>
    %112 = arith.divf %110, %111 : vector<8x32xf32>
    %113 = vector.extract_strided_slice %93 {offsets = [0, 64], sizes = [8, 32], strides = [1, 1]} : vector<8x128xf32> to vector<8x32xf32>
    %114 = vector.extract_strided_slice %96 {offsets = [0, 64], sizes = [8, 32], strides = [1, 1]} : vector<8x128xf32> to vector<8x32xf32>
    %115 = arith.mulf %104, %114 : vector<8x32xf32>
    %116 = arith.addf %113, %115 : vector<8x32xf32>
    %117 = math.tanh %116 : vector<8x32xf32>
    %cst_41 = arith.constant 1.000000e+00 : f32
    %118 = vector.broadcast %cst_41 : f32 to vector<8x32xf32>
    %119 = arith.subf %118, %112 : vector<8x32xf32>
    %120 = arith.mulf %119, %117 : vector<8x32xf32>
    %121 = arith.mulf %112, %86 : vector<8x32xf32>
    %122 = arith.addf %120, %121 : vector<8x32xf32>
    %123 = arith.index_cast %c2_i32 : i32 to index
    %c0_42 = arith.constant 0 : index
    %c0_43 = arith.constant 0 : index
    %124 = vector.load %arg16[%123, %c0_42, %c0_43] : memref<8x8x32xf32, #tpu.memory_space<vmem>>, vector<1x8x32xf32>
    %125 = vector.shape_cast %124 : vector<1x8x32xf32> to vector<8x32xf32>
    %126 = vector.shape_cast %122 : vector<8x32xf32> to vector<1x8x32xf32>
    tpu.vector_store %arg16[%123, %c0_42, %c0_43], %126 {strides = array<i32>} : memref<8x8x32xf32, #tpu.memory_space<vmem>>, vector<1x8x32xf32>,
    %c3_i32 = arith.constant 3 : i32
    %127 = arith.index_cast %c3_i32 : i32 to index
    %c0_44 = arith.constant 0 : index
    %c0_45 = arith.constant 0 : index
    %128 = vector.load %arg15[%127, %c0_44, %c0_45] : memref<8x8x128xf32, #tpu.memory_space<vmem>>, vector<1x8x128xf32>
    %129 = vector.shape_cast %128 : vector<1x8x128xf32> to vector<8x128xf32>
    %cst_46 = arith.constant dense<0.000000e+00> : vector<8x128xf32>
    %130 = tpu.matmul %122, %17, %cst_46 {dimension_numbers = #tpu.dot_dimension_numbers<[1], [0], [0], [1], [0, 0, 1, 1], [], []>} : vector<8x32xf32>, vector<32x128xf32>, vector<8x128xf32> -> vector<8x128xf32>
    %131 = vector.broadcast %18 : vector<1x128xf32> to vector<8x128xf32>
    %132 = arith.addf %130, %131 : vector<8x128xf32>
    %133 = vector.extract_strided_slice %129 {offsets = [0, 0], sizes = [8, 32], strides = [1, 1]} : vector<8x128xf32> to vector<8x32xf32>
    %134 = vector.extract_strided_slice %132 {offsets = [0, 0], sizes = [8, 32], strides = [1, 1]} : vector<8x128xf32> to vector<8x32xf32>
    %135 = arith.addf %133, %134 : vector<8x32xf32>
    %136 = arith.negf %135 : vector<8x32xf32>
    %137 = math.exp %136 : vector<8x32xf32>
    %cst_47 = arith.constant 1.000000e+00 : f32
    %138 = vector.broadcast %cst_47 : f32 to vector<8x32xf32>
    %139 = arith.addf %138, %137 : vector<8x32xf32>
    %140 = arith.divf %138, %139 : vector<8x32xf32>
    %141 = vector.extract_strided_slice %129 {offsets = [0, 32], sizes = [8, 32], strides = [1, 1]} : vector<8x128xf32> to vector<8x32xf32>
    %142 = vector.extract_strided_slice %132 {offsets = [0, 32], sizes = [8, 32], strides = [1, 1]} : vector<8x128xf32> to vector<8x32xf32>
    %143 = arith.addf %141, %142 : vector<8x32xf32>
    %144 = arith.negf %143 : vector<8x32xf32>
    %145 = math.exp %144 : vector<8x32xf32>
    %cst_48 = arith.constant 1.000000e+00 : f32
    %146 = vector.broadcast %cst_48 : f32 to vector<8x32xf32>
    %147 = arith.addf %146, %145 : vector<8x32xf32>
    %148 = arith.divf %146, %147 : vector<8x32xf32>
    %149 = vector.extract_strided_slice %129 {offsets = [0, 64], sizes = [8, 32], strides = [1, 1]} : vector<8x128xf32> to vector<8x32xf32>
    %150 = vector.extract_strided_slice %132 {offsets = [0, 64], sizes = [8, 32], strides = [1, 1]} : vector<8x128xf32> to vector<8x32xf32>
    %151 = arith.mulf %140, %150 : vector<8x32xf32>
    %152 = arith.addf %149, %151 : vector<8x32xf32>
    %153 = math.tanh %152 : vector<8x32xf32>
    %cst_49 = arith.constant 1.000000e+00 : f32
    %154 = vector.broadcast %cst_49 : f32 to vector<8x32xf32>
    %155 = arith.subf %154, %148 : vector<8x32xf32>
    %156 = arith.mulf %155, %153 : vector<8x32xf32>
    %157 = arith.mulf %148, %122 : vector<8x32xf32>
    %158 = arith.addf %156, %157 : vector<8x32xf32>
    %159 = arith.index_cast %c3_i32 : i32 to index
    %c0_50 = arith.constant 0 : index
    %c0_51 = arith.constant 0 : index
    %160 = vector.load %arg16[%159, %c0_50, %c0_51] : memref<8x8x32xf32, #tpu.memory_space<vmem>>, vector<1x8x32xf32>
    %161 = vector.shape_cast %160 : vector<1x8x32xf32> to vector<8x32xf32>
    %162 = vector.shape_cast %158 : vector<8x32xf32> to vector<1x8x32xf32>
    tpu.vector_store %arg16[%159, %c0_50, %c0_51], %162 {strides = array<i32>} : memref<8x8x32xf32, #tpu.memory_space<vmem>>, vector<1x8x32xf32>,
    %c4_i32 = arith.constant 4 : i32
    %163 = arith.index_cast %c4_i32 : i32 to index
    %c0_52 = arith.constant 0 : index
    %c0_53 = arith.constant 0 : index
    %164 = vector.load %arg15[%163, %c0_52, %c0_53] : memref<8x8x128xf32, #tpu.memory_space<vmem>>, vector<1x8x128xf32>
    %165 = vector.shape_cast %164 : vector<1x8x128xf32> to vector<8x128xf32>
    %cst_54 = arith.constant dense<0.000000e+00> : vector<8x128xf32>
    %166 = tpu.matmul %158, %17, %cst_54 {dimension_numbers = #tpu.dot_dimension_numbers<[1], [0], [0], [1], [0, 0, 1, 1], [], []>} : vector<8x32xf32>, vector<32x128xf32>, vector<8x128xf32> -> vector<8x128xf32>
    %167 = vector.broadcast %18 : vector<1x128xf32> to vector<8x128xf32>
    %168 = arith.addf %166, %167 : vector<8x128xf32>
    %169 = vector.extract_strided_slice %165 {offsets = [0, 0], sizes = [8, 32], strides = [1, 1]} : vector<8x128xf32> to vector<8x32xf32>
    %170 = vector.extract_strided_slice %168 {offsets = [0, 0], sizes = [8, 32], strides = [1, 1]} : vector<8x128xf32> to vector<8x32xf32>
    %171 = arith.addf %169, %170 : vector<8x32xf32>
    %172 = arith.negf %171 : vector<8x32xf32>
    %173 = math.exp %172 : vector<8x32xf32>
    %cst_55 = arith.constant 1.000000e+00 : f32
    %174 = vector.broadcast %cst_55 : f32 to vector<8x32xf32>
    %175 = arith.addf %174, %173 : vector<8x32xf32>
    %176 = arith.divf %174, %175 : vector<8x32xf32>
    %177 = vector.extract_strided_slice %165 {offsets = [0, 32], sizes = [8, 32], strides = [1, 1]} : vector<8x128xf32> to vector<8x32xf32>
    %178 = vector.extract_strided_slice %168 {offsets = [0, 32], sizes = [8, 32], strides = [1, 1]} : vector<8x128xf32> to vector<8x32xf32>
    %179 = arith.addf %177, %178 : vector<8x32xf32>
    %180 = arith.negf %179 : vector<8x32xf32>
    %181 = math.exp %180 : vector<8x32xf32>
    %cst_56 = arith.constant 1.000000e+00 : f32
    %182 = vector.broadcast %cst_56 : f32 to vector<8x32xf32>
    %183 = arith.addf %182, %181 : vector<8x32xf32>
    %184 = arith.divf %182, %183 : vector<8x32xf32>
    %185 = vector.extract_strided_slice %165 {offsets = [0, 64], sizes = [8, 32], strides = [1, 1]} : vector<8x128xf32> to vector<8x32xf32>
    %186 = vector.extract_strided_slice %168 {offsets = [0, 64], sizes = [8, 32], strides = [1, 1]} : vector<8x128xf32> to vector<8x32xf32>
    %187 = arith.mulf %176, %186 : vector<8x32xf32>
    %188 = arith.addf %185, %187 : vector<8x32xf32>
    %189 = math.tanh %188 : vector<8x32xf32>
    %cst_57 = arith.constant 1.000000e+00 : f32
    %190 = vector.broadcast %cst_57 : f32 to vector<8x32xf32>
    %191 = arith.subf %190, %184 : vector<8x32xf32>
    %192 = arith.mulf %191, %189 : vector<8x32xf32>
    %193 = arith.mulf %184, %158 : vector<8x32xf32>
    %194 = arith.addf %192, %193 : vector<8x32xf32>
    %195 = arith.index_cast %c4_i32 : i32 to index
    %c0_58 = arith.constant 0 : index
    %c0_59 = arith.constant 0 : index
    %196 = vector.load %arg16[%195, %c0_58, %c0_59] : memref<8x8x32xf32, #tpu.memory_space<vmem>>, vector<1x8x32xf32>
    %197 = vector.shape_cast %196 : vector<1x8x32xf32> to vector<8x32xf32>
    %198 = vector.shape_cast %194 : vector<8x32xf32> to vector<1x8x32xf32>
    tpu.vector_store %arg16[%195, %c0_58, %c0_59], %198 {strides = array<i32>} : memref<8x8x32xf32, #tpu.memory_space<vmem>>, vector<1x8x32xf32>,
    %c5_i32 = arith.constant 5 : i32
    %199 = arith.index_cast %c5_i32 : i32 to index
    %c0_60 = arith.constant 0 : index
    %c0_61 = arith.constant 0 : index
    %200 = vector.load %arg15[%199, %c0_60, %c0_61] : memref<8x8x128xf32, #tpu.memory_space<vmem>>, vector<1x8x128xf32>
    %201 = vector.shape_cast %200 : vector<1x8x128xf32> to vector<8x128xf32>
    %cst_62 = arith.constant dense<0.000000e+00> : vector<8x128xf32>
    %202 = tpu.matmul %194, %17, %cst_62 {dimension_numbers = #tpu.dot_dimension_numbers<[1], [0], [0], [1], [0, 0, 1, 1], [], []>} : vector<8x32xf32>, vector<32x128xf32>, vector<8x128xf32> -> vector<8x128xf32>
    %203 = vector.broadcast %18 : vector<1x128xf32> to vector<8x128xf32>
    %204 = arith.addf %202, %203 : vector<8x128xf32>
    %205 = vector.extract_strided_slice %201 {offsets = [0, 0], sizes = [8, 32], strides = [1, 1]} : vector<8x128xf32> to vector<8x32xf32>
    %206 = vector.extract_strided_slice %204 {offsets = [0, 0], sizes = [8, 32], strides = [1, 1]} : vector<8x128xf32> to vector<8x32xf32>
    %207 = arith.addf %205, %206 : vector<8x32xf32>
    %208 = arith.negf %207 : vector<8x32xf32>
    %209 = math.exp %208 : vector<8x32xf32>
    %cst_63 = arith.constant 1.000000e+00 : f32
    %210 = vector.broadcast %cst_63 : f32 to vector<8x32xf32>
    %211 = arith.addf %210, %209 : vector<8x32xf32>
    %212 = arith.divf %210, %211 : vector<8x32xf32>
    %213 = vector.extract_strided_slice %201 {offsets = [0, 32], sizes = [8, 32], strides = [1, 1]} : vector<8x128xf32> to vector<8x32xf32>
    %214 = vector.extract_strided_slice %204 {offsets = [0, 32], sizes = [8, 32], strides = [1, 1]} : vector<8x128xf32> to vector<8x32xf32>
    %215 = arith.addf %213, %214 : vector<8x32xf32>
    %216 = arith.negf %215 : vector<8x32xf32>
    %217 = math.exp %216 : vector<8x32xf32>
    %cst_64 = arith.constant 1.000000e+00 : f32
    %218 = vector.broadcast %cst_64 : f32 to vector<8x32xf32>
    %219 = arith.addf %218, %217 : vector<8x32xf32>
    %220 = arith.divf %218, %219 : vector<8x32xf32>
    %221 = vector.extract_strided_slice %201 {offsets = [0, 64], sizes = [8, 32], strides = [1, 1]} : vector<8x128xf32> to vector<8x32xf32>
    %222 = vector.extract_strided_slice %204 {offsets = [0, 64], sizes = [8, 32], strides = [1, 1]} : vector<8x128xf32> to vector<8x32xf32>
    %223 = arith.mulf %212, %222 : vector<8x32xf32>
    %224 = arith.addf %221, %223 : vector<8x32xf32>
    %225 = math.tanh %224 : vector<8x32xf32>
    %cst_65 = arith.constant 1.000000e+00 : f32
    %226 = vector.broadcast %cst_65 : f32 to vector<8x32xf32>
    %227 = arith.subf %226, %220 : vector<8x32xf32>
    %228 = arith.mulf %227, %225 : vector<8x32xf32>
    %229 = arith.mulf %220, %194 : vector<8x32xf32>
    %230 = arith.addf %228, %229 : vector<8x32xf32>
    %231 = arith.index_cast %c5_i32 : i32 to index
    %c0_66 = arith.constant 0 : index
    %c0_67 = arith.constant 0 : index
    %232 = vector.load %arg16[%231, %c0_66, %c0_67] : memref<8x8x32xf32, #tpu.memory_space<vmem>>, vector<1x8x32xf32>
    %233 = vector.shape_cast %232 : vector<1x8x32xf32> to vector<8x32xf32>
    %234 = vector.shape_cast %230 : vector<8x32xf32> to vector<1x8x32xf32>
    tpu.vector_store %arg16[%231, %c0_66, %c0_67], %234 {strides = array<i32>} : memref<8x8x32xf32, #tpu.memory_space<vmem>>, vector<1x8x32xf32>,
    %c6_i32 = arith.constant 6 : i32
    %235 = arith.index_cast %c6_i32 : i32 to index
    %c0_68 = arith.constant 0 : index
    %c0_69 = arith.constant 0 : index
    %236 = vector.load %arg15[%235, %c0_68, %c0_69] : memref<8x8x128xf32, #tpu.memory_space<vmem>>, vector<1x8x128xf32>
    %237 = vector.shape_cast %236 : vector<1x8x128xf32> to vector<8x128xf32>
    %cst_70 = arith.constant dense<0.000000e+00> : vector<8x128xf32>
    %238 = tpu.matmul %230, %17, %cst_70 {dimension_numbers = #tpu.dot_dimension_numbers<[1], [0], [0], [1], [0, 0, 1, 1], [], []>} : vector<8x32xf32>, vector<32x128xf32>, vector<8x128xf32> -> vector<8x128xf32>
    %239 = vector.broadcast %18 : vector<1x128xf32> to vector<8x128xf32>
    %240 = arith.addf %238, %239 : vector<8x128xf32>
    %241 = vector.extract_strided_slice %237 {offsets = [0, 0], sizes = [8, 32], strides = [1, 1]} : vector<8x128xf32> to vector<8x32xf32>
    %242 = vector.extract_strided_slice %240 {offsets = [0, 0], sizes = [8, 32], strides = [1, 1]} : vector<8x128xf32> to vector<8x32xf32>
    %243 = arith.addf %241, %242 : vector<8x32xf32>
    %244 = arith.negf %243 : vector<8x32xf32>
    %245 = math.exp %244 : vector<8x32xf32>
    %cst_71 = arith.constant 1.000000e+00 : f32
    %246 = vector.broadcast %cst_71 : f32 to vector<8x32xf32>
    %247 = arith.addf %246, %245 : vector<8x32xf32>
    %248 = arith.divf %246, %247 : vector<8x32xf32>
    %249 = vector.extract_strided_slice %237 {offsets = [0, 32], sizes = [8, 32], strides = [1, 1]} : vector<8x128xf32> to vector<8x32xf32>
    %250 = vector.extract_strided_slice %240 {offsets = [0, 32], sizes = [8, 32], strides = [1, 1]} : vector<8x128xf32> to vector<8x32xf32>
    %251 = arith.addf %249, %250 : vector<8x32xf32>
    %252 = arith.negf %251 : vector<8x32xf32>
    %253 = math.exp %252 : vector<8x32xf32>
    %cst_72 = arith.constant 1.000000e+00 : f32
    %254 = vector.broadcast %cst_72 : f32 to vector<8x32xf32>
    %255 = arith.addf %254, %253 : vector<8x32xf32>
    %256 = arith.divf %254, %255 : vector<8x32xf32>
    %257 = vector.extract_strided_slice %237 {offsets = [0, 64], sizes = [8, 32], strides = [1, 1]} : vector<8x128xf32> to vector<8x32xf32>
    %258 = vector.extract_strided_slice %240 {offsets = [0, 64], sizes = [8, 32], strides = [1, 1]} : vector<8x128xf32> to vector<8x32xf32>
    %259 = arith.mulf %248, %258 : vector<8x32xf32>
    %260 = arith.addf %257, %259 : vector<8x32xf32>
    %261 = math.tanh %260 : vector<8x32xf32>
    %cst_73 = arith.constant 1.000000e+00 : f32
    %262 = vector.broadcast %cst_73 : f32 to vector<8x32xf32>
    %263 = arith.subf %262, %256 : vector<8x32xf32>
    %264 = arith.mulf %263, %261 : vector<8x32xf32>
    %265 = arith.mulf %256, %230 : vector<8x32xf32>
    %266 = arith.addf %264, %265 : vector<8x32xf32>
    %267 = arith.index_cast %c6_i32 : i32 to index
    %c0_74 = arith.constant 0 : index
    %c0_75 = arith.constant 0 : index
    %268 = vector.load %arg16[%267, %c0_74, %c0_75] : memref<8x8x32xf32, #tpu.memory_space<vmem>>, vector<1x8x32xf32>
    %269 = vector.shape_cast %268 : vector<1x8x32xf32> to vector<8x32xf32>
    %270 = vector.shape_cast %266 : vector<8x32xf32> to vector<1x8x32xf32>
    tpu.vector_store %arg16[%267, %c0_74, %c0_75], %270 {strides = array<i32>} : memref<8x8x32xf32, #tpu.memory_space<vmem>>, vector<1x8x32xf32>,
    %c7_i32 = arith.constant 7 : i32
    %271 = arith.index_cast %c7_i32 : i32 to index
    %c0_76 = arith.constant 0 : index
    %c0_77 = arith.constant 0 : index
    %272 = vector.load %arg15[%271, %c0_76, %c0_77] : memref<8x8x128xf32, #tpu.memory_space<vmem>>, vector<1x8x128xf32>
    %273 = vector.shape_cast %272 : vector<1x8x128xf32> to vector<8x128xf32>
    %cst_78 = arith.constant dense<0.000000e+00> : vector<8x128xf32>
    %274 = tpu.matmul %266, %17, %cst_78 {dimension_numbers = #tpu.dot_dimension_numbers<[1], [0], [0], [1], [0, 0, 1, 1], [], []>} : vector<8x32xf32>, vector<32x128xf32>, vector<8x128xf32> -> vector<8x128xf32>
    %275 = vector.broadcast %18 : vector<1x128xf32> to vector<8x128xf32>
    %276 = arith.addf %274, %275 : vector<8x128xf32>
    %277 = vector.extract_strided_slice %273 {offsets = [0, 0], sizes = [8, 32], strides = [1, 1]} : vector<8x128xf32> to vector<8x32xf32>
    %278 = vector.extract_strided_slice %276 {offsets = [0, 0], sizes = [8, 32], strides = [1, 1]} : vector<8x128xf32> to vector<8x32xf32>
    %279 = arith.addf %277, %278 : vector<8x32xf32>
    %280 = arith.negf %279 : vector<8x32xf32>
    %281 = math.exp %280 : vector<8x32xf32>
    %cst_79 = arith.constant 1.000000e+00 : f32
    %282 = vector.broadcast %cst_79 : f32 to vector<8x32xf32>
    %283 = arith.addf %282, %281 : vector<8x32xf32>
    %284 = arith.divf %282, %283 : vector<8x32xf32>
    %285 = vector.extract_strided_slice %273 {offsets = [0, 32], sizes = [8, 32], strides = [1, 1]} : vector<8x128xf32> to vector<8x32xf32>
    %286 = vector.extract_strided_slice %276 {offsets = [0, 32], sizes = [8, 32], strides = [1, 1]} : vector<8x128xf32> to vector<8x32xf32>
    %287 = arith.addf %285, %286 : vector<8x32xf32>
    %288 = arith.negf %287 : vector<8x32xf32>
    %289 = math.exp %288 : vector<8x32xf32>
    %cst_80 = arith.constant 1.000000e+00 : f32
    %290 = vector.broadcast %cst_80 : f32 to vector<8x32xf32>
    %291 = arith.addf %290, %289 : vector<8x32xf32>
    %292 = arith.divf %290, %291 : vector<8x32xf32>
    %293 = vector.extract_strided_slice %273 {offsets = [0, 64], sizes = [8, 32], strides = [1, 1]} : vector<8x128xf32> to vector<8x32xf32>
    %294 = vector.extract_strided_slice %276 {offsets = [0, 64], sizes = [8, 32], strides = [1, 1]} : vector<8x128xf32> to vector<8x32xf32>
    %295 = arith.mulf %284, %294 : vector<8x32xf32>
    %296 = arith.addf %293, %295 : vector<8x32xf32>
    %297 = math.tanh %296 : vector<8x32xf32>
    %cst_81 = arith.constant 1.000000e+00 : f32
    %298 = vector.broadcast %cst_81 : f32 to vector<8x32xf32>
    %299 = arith.subf %298, %292 : vector<8x32xf32>
    %300 = arith.mulf %299, %297 : vector<8x32xf32>
    %301 = arith.mulf %292, %266 : vector<8x32xf32>
    %302 = arith.addf %300, %301 : vector<8x32xf32>
    %303 = arith.index_cast %c7_i32 : i32 to index
    %c0_82 = arith.constant 0 : index
    %c0_83 = arith.constant 0 : index
    %304 = vector.load %arg16[%303, %c0_82, %c0_83] : memref<8x8x32xf32, #tpu.memory_space<vmem>>, vector<1x8x32xf32>
    %305 = vector.shape_cast %304 : vector<1x8x32xf32> to vector<8x32xf32>
    %306 = vector.shape_cast %302 : vector<8x32xf32> to vector<1x8x32xf32>
    tpu.vector_store %arg16[%303, %c0_82, %c0_83], %306 {strides = array<i32>} : memref<8x8x32xf32, #tpu.memory_space<vmem>>, vector<1x8x32xf32>,
    %c8_i32 = arith.constant 8 : i32
    %c0_84 = arith.constant 0 : index
    %c0_85 = arith.constant 0 : index
    %c0_86 = arith.constant 0 : index
    %307 = vector.load %arg16[%c0_84, %c0_85, %c0_86] : memref<8x8x32xf32, #tpu.memory_space<vmem>>, vector<8x8x32xf32>
    %308 = vector.shape_cast %307 : vector<8x8x32xf32> to vector<64x32xf32>
    %c0_87 = arith.constant 0 : index
    %c0_88 = arith.constant 0 : index
    %309 = vector.load %arg8[%c0_87, %c0_88] : memref<32x128xf32, #tpu.memory_space<vmem>>, vector<32x128xf32>
    %cst_89 = arith.constant dense<0.000000e+00> : vector<64x128xf32>
    %310 = tpu.matmul %308, %309, %cst_89 {dimension_numbers = #tpu.dot_dimension_numbers<[1], [0], [0], [1], [0, 0, 1, 1], [], []>} : vector<64x32xf32>, vector<32x128xf32>, vector<64x128xf32> -> vector<64x128xf32>
    %c0_90 = arith.constant 0 : index
    %c0_91 = arith.constant 0 : index
    %311 = vector.load %arg10[%c0_90, %c0_91] : memref<1x128xf32, #tpu.memory_space<vmem>>, vector<1x128xf32>
    %312 = vector.broadcast %311 : vector<1x128xf32> to vector<64x128xf32>
    %313 = arith.addf %310, %312 : vector<64x128xf32>
    %314 = vector.shape_cast %313 : vector<64x128xf32> to vector<8x8x128xf32>
    %c0_92 = arith.constant 0 : index
    %c0_93 = arith.constant 0 : index
    %c0_94 = arith.constant 0 : index
    %315 = vector.load %arg15[%c0_92, %c0_93, %c0_94] : memref<8x8x128xf32, #tpu.memory_space<vmem>>, vector<8x8x128xf32>
    tpu.vector_store %arg15[%c0_92, %c0_93, %c0_94], %314 {strides = array<i32>} : memref<8x8x128xf32, #tpu.memory_space<vmem>>, vector<8x8x128xf32>,
    %c0_95 = arith.constant 0 : index
    %c0_96 = arith.constant 0 : index
    %316 = vector.load %arg9[%c0_95, %c0_96] : memref<32x128xf32, #tpu.memory_space<vmem>>, vector<32x128xf32>
    %c0_97 = arith.constant 0 : index
    %c0_98 = arith.constant 0 : index
    %317 = vector.load %arg11[%c0_97, %c0_98] : memref<1x128xf32, #tpu.memory_space<vmem>>, vector<1x128xf32>
    %c0_i32_99 = arith.constant 0 : i32
    %318 = arith.index_cast %c0_i32_99 : i32 to index
    %c0_100 = arith.constant 0 : index
    %c0_101 = arith.constant 0 : index
    %319 = vector.load %arg15[%318, %c0_100, %c0_101] : memref<8x8x128xf32, #tpu.memory_space<vmem>>, vector<1x8x128xf32>
    %320 = vector.shape_cast %319 : vector<1x8x128xf32> to vector<8x128xf32>
    %cst_102 = arith.constant dense<0.000000e+00> : vector<8x128xf32>
    %321 = tpu.matmul %9, %316, %cst_102 {dimension_numbers = #tpu.dot_dimension_numbers<[1], [0], [0], [1], [0, 0, 1, 1], [], []>} : vector<8x32xf32>, vector<32x128xf32>, vector<8x128xf32> -> vector<8x128xf32>
    %322 = vector.broadcast %317 : vector<1x128xf32> to vector<8x128xf32>
    %323 = arith.addf %321, %322 : vector<8x128xf32>
    %324 = vector.extract_strided_slice %320 {offsets = [0, 0], sizes = [8, 32], strides = [1, 1]} : vector<8x128xf32> to vector<8x32xf32>
    %325 = vector.extract_strided_slice %323 {offsets = [0, 0], sizes = [8, 32], strides = [1, 1]} : vector<8x128xf32> to vector<8x32xf32>
    %326 = arith.addf %324, %325 : vector<8x32xf32>
    %327 = arith.negf %326 : vector<8x32xf32>
    %328 = math.exp %327 : vector<8x32xf32>
    %cst_103 = arith.constant 1.000000e+00 : f32
    %329 = vector.broadcast %cst_103 : f32 to vector<8x32xf32>
    %330 = arith.addf %329, %328 : vector<8x32xf32>
    %331 = arith.divf %329, %330 : vector<8x32xf32>
    %332 = vector.extract_strided_slice %320 {offsets = [0, 32], sizes = [8, 32], strides = [1, 1]} : vector<8x128xf32> to vector<8x32xf32>
    %333 = vector.extract_strided_slice %323 {offsets = [0, 32], sizes = [8, 32], strides = [1, 1]} : vector<8x128xf32> to vector<8x32xf32>
    %334 = arith.addf %332, %333 : vector<8x32xf32>
    %335 = arith.negf %334 : vector<8x32xf32>
    %336 = math.exp %335 : vector<8x32xf32>
    %cst_104 = arith.constant 1.000000e+00 : f32
    %337 = vector.broadcast %cst_104 : f32 to vector<8x32xf32>
    %338 = arith.addf %337, %336 : vector<8x32xf32>
    %339 = arith.divf %337, %338 : vector<8x32xf32>
    %340 = vector.extract_strided_slice %320 {offsets = [0, 64], sizes = [8, 32], strides = [1, 1]} : vector<8x128xf32> to vector<8x32xf32>
    %341 = vector.extract_strided_slice %323 {offsets = [0, 64], sizes = [8, 32], strides = [1, 1]} : vector<8x128xf32> to vector<8x32xf32>
    %342 = arith.mulf %331, %341 : vector<8x32xf32>
    %343 = arith.addf %340, %342 : vector<8x32xf32>
    %344 = math.tanh %343 : vector<8x32xf32>
    %cst_105 = arith.constant 1.000000e+00 : f32
    %345 = vector.broadcast %cst_105 : f32 to vector<8x32xf32>
    %346 = arith.subf %345, %339 : vector<8x32xf32>
    %347 = arith.mulf %346, %344 : vector<8x32xf32>
    %348 = arith.mulf %339, %9 : vector<8x32xf32>
    %349 = arith.addf %347, %348 : vector<8x32xf32>
    %c1_i32_106 = arith.constant 1 : i32
    %350 = arith.index_cast %c1_i32_106 : i32 to index
    %c0_107 = arith.constant 0 : index
    %c0_108 = arith.constant 0 : index
    %351 = vector.load %arg15[%350, %c0_107, %c0_108] : memref<8x8x128xf32, #tpu.memory_space<vmem>>, vector<1x8x128xf32>
    %352 = vector.shape_cast %351 : vector<1x8x128xf32> to vector<8x128xf32>
    %cst_109 = arith.constant dense<0.000000e+00> : vector<8x128xf32>
    %353 = tpu.matmul %349, %316, %cst_109 {dimension_numbers = #tpu.dot_dimension_numbers<[1], [0], [0], [1], [0, 0, 1, 1], [], []>} : vector<8x32xf32>, vector<32x128xf32>, vector<8x128xf32> -> vector<8x128xf32>
    %354 = vector.broadcast %317 : vector<1x128xf32> to vector<8x128xf32>
    %355 = arith.addf %353, %354 : vector<8x128xf32>
    %356 = vector.extract_strided_slice %352 {offsets = [0, 0], sizes = [8, 32], strides = [1, 1]} : vector<8x128xf32> to vector<8x32xf32>
    %357 = vector.extract_strided_slice %355 {offsets = [0, 0], sizes = [8, 32], strides = [1, 1]} : vector<8x128xf32> to vector<8x32xf32>
    %358 = arith.addf %356, %357 : vector<8x32xf32>
    %359 = arith.negf %358 : vector<8x32xf32>
    %360 = math.exp %359 : vector<8x32xf32>
    %cst_110 = arith.constant 1.000000e+00 : f32
    %361 = vector.broadcast %cst_110 : f32 to vector<8x32xf32>
    %362 = arith.addf %361, %360 : vector<8x32xf32>
    %363 = arith.divf %361, %362 : vector<8x32xf32>
    %364 = vector.extract_strided_slice %352 {offsets = [0, 32], sizes = [8, 32], strides = [1, 1]} : vector<8x128xf32> to vector<8x32xf32>
    %365 = vector.extract_strided_slice %355 {offsets = [0, 32], sizes = [8, 32], strides = [1, 1]} : vector<8x128xf32> to vector<8x32xf32>
    %366 = arith.addf %364, %365 : vector<8x32xf32>
    %367 = arith.negf %366 : vector<8x32xf32>
    %368 = math.exp %367 : vector<8x32xf32>
    %cst_111 = arith.constant 1.000000e+00 : f32
    %369 = vector.broadcast %cst_111 : f32 to vector<8x32xf32>
    %370 = arith.addf %369, %368 : vector<8x32xf32>
    %371 = arith.divf %369, %370 : vector<8x32xf32>
    %372 = vector.extract_strided_slice %352 {offsets = [0, 64], sizes = [8, 32], strides = [1, 1]} : vector<8x128xf32> to vector<8x32xf32>
    %373 = vector.extract_strided_slice %355 {offsets = [0, 64], sizes = [8, 32], strides = [1, 1]} : vector<8x128xf32> to vector<8x32xf32>
    %374 = arith.mulf %363, %373 : vector<8x32xf32>
    %375 = arith.addf %372, %374 : vector<8x32xf32>
    %376 = math.tanh %375 : vector<8x32xf32>
    %cst_112 = arith.constant 1.000000e+00 : f32
    %377 = vector.broadcast %cst_112 : f32 to vector<8x32xf32>
    %378 = arith.subf %377, %371 : vector<8x32xf32>
    %379 = arith.mulf %378, %376 : vector<8x32xf32>
    %380 = arith.mulf %371, %349 : vector<8x32xf32>
    %381 = arith.addf %379, %380 : vector<8x32xf32>
    %c2_i32_113 = arith.constant 2 : i32
    %382 = arith.index_cast %c2_i32_113 : i32 to index
    %c0_114 = arith.constant 0 : index
    %c0_115 = arith.constant 0 : index
    %383 = vector.load %arg15[%382, %c0_114, %c0_115] : memref<8x8x128xf32, #tpu.memory_space<vmem>>, vector<1x8x128xf32>
    %384 = vector.shape_cast %383 : vector<1x8x128xf32> to vector<8x128xf32>
    %cst_116 = arith.constant dense<0.000000e+00> : vector<8x128xf32>
    %385 = tpu.matmul %381, %316, %cst_116 {dimension_numbers = #tpu.dot_dimension_numbers<[1], [0], [0], [1], [0, 0, 1, 1], [], []>} : vector<8x32xf32>, vector<32x128xf32>, vector<8x128xf32> -> vector<8x128xf32>
    %386 = vector.broadcast %317 : vector<1x128xf32> to vector<8x128xf32>
    %387 = arith.addf %385, %386 : vector<8x128xf32>
    %388 = vector.extract_strided_slice %384 {offsets = [0, 0], sizes = [8, 32], strides = [1, 1]} : vector<8x128xf32> to vector<8x32xf32>
    %389 = vector.extract_strided_slice %387 {offsets = [0, 0], sizes = [8, 32], strides = [1, 1]} : vector<8x128xf32> to vector<8x32xf32>
    %390 = arith.addf %388, %389 : vector<8x32xf32>
    %391 = arith.negf %390 : vector<8x32xf32>
    %392 = math.exp %391 : vector<8x32xf32>
    %cst_117 = arith.constant 1.000000e+00 : f32
    %393 = vector.broadcast %cst_117 : f32 to vector<8x32xf32>
    %394 = arith.addf %393, %392 : vector<8x32xf32>
    %395 = arith.divf %393, %394 : vector<8x32xf32>
    %396 = vector.extract_strided_slice %384 {offsets = [0, 32], sizes = [8, 32], strides = [1, 1]} : vector<8x128xf32> to vector<8x32xf32>
    %397 = vector.extract_strided_slice %387 {offsets = [0, 32], sizes = [8, 32], strides = [1, 1]} : vector<8x128xf32> to vector<8x32xf32>
    %398 = arith.addf %396, %397 : vector<8x32xf32>
    %399 = arith.negf %398 : vector<8x32xf32>
    %400 = math.exp %399 : vector<8x32xf32>
    %cst_118 = arith.constant 1.000000e+00 : f32
    %401 = vector.broadcast %cst_118 : f32 to vector<8x32xf32>
    %402 = arith.addf %401, %400 : vector<8x32xf32>
    %403 = arith.divf %401, %402 : vector<8x32xf32>
    %404 = vector.extract_strided_slice %384 {offsets = [0, 64], sizes = [8, 32], strides = [1, 1]} : vector<8x128xf32> to vector<8x32xf32>
    %405 = vector.extract_strided_slice %387 {offsets = [0, 64], sizes = [8, 32], strides = [1, 1]} : vector<8x128xf32> to vector<8x32xf32>
    %406 = arith.mulf %395, %405 : vector<8x32xf32>
    %407 = arith.addf %404, %406 : vector<8x32xf32>
    %408 = math.tanh %407 : vector<8x32xf32>
    %cst_119 = arith.constant 1.000000e+00 : f32
    %409 = vector.broadcast %cst_119 : f32 to vector<8x32xf32>
    %410 = arith.subf %409, %403 : vector<8x32xf32>
    %411 = arith.mulf %410, %408 : vector<8x32xf32>
    %412 = arith.mulf %403, %381 : vector<8x32xf32>
    %413 = arith.addf %411, %412 : vector<8x32xf32>
    %c3_i32_120 = arith.constant 3 : i32
    %414 = arith.index_cast %c3_i32_120 : i32 to index
    %c0_121 = arith.constant 0 : index
    %c0_122 = arith.constant 0 : index
    %415 = vector.load %arg15[%414, %c0_121, %c0_122] : memref<8x8x128xf32, #tpu.memory_space<vmem>>, vector<1x8x128xf32>
    %416 = vector.shape_cast %415 : vector<1x8x128xf32> to vector<8x128xf32>
    %cst_123 = arith.constant dense<0.000000e+00> : vector<8x128xf32>
    %417 = tpu.matmul %413, %316, %cst_123 {dimension_numbers = #tpu.dot_dimension_numbers<[1], [0], [0], [1], [0, 0, 1, 1], [], []>} : vector<8x32xf32>, vector<32x128xf32>, vector<8x128xf32> -> vector<8x128xf32>
    %418 = vector.broadcast %317 : vector<1x128xf32> to vector<8x128xf32>
    %419 = arith.addf %417, %418 : vector<8x128xf32>
    %420 = vector.extract_strided_slice %416 {offsets = [0, 0], sizes = [8, 32], strides = [1, 1]} : vector<8x128xf32> to vector<8x32xf32>
    %421 = vector.extract_strided_slice %419 {offsets = [0, 0], sizes = [8, 32], strides = [1, 1]} : vector<8x128xf32> to vector<8x32xf32>
    %422 = arith.addf %420, %421 : vector<8x32xf32>
    %423 = arith.negf %422 : vector<8x32xf32>
    %424 = math.exp %423 : vector<8x32xf32>
    %cst_124 = arith.constant 1.000000e+00 : f32
    %425 = vector.broadcast %cst_124 : f32 to vector<8x32xf32>
    %426 = arith.addf %425, %424 : vector<8x32xf32>
    %427 = arith.divf %425, %426 : vector<8x32xf32>
    %428 = vector.extract_strided_slice %416 {offsets = [0, 32], sizes = [8, 32], strides = [1, 1]} : vector<8x128xf32> to vector<8x32xf32>
    %429 = vector.extract_strided_slice %419 {offsets = [0, 32], sizes = [8, 32], strides = [1, 1]} : vector<8x128xf32> to vector<8x32xf32>
    %430 = arith.addf %428, %429 : vector<8x32xf32>
    %431 = arith.negf %430 : vector<8x32xf32>
    %432 = math.exp %431 : vector<8x32xf32>
    %cst_125 = arith.constant 1.000000e+00 : f32
    %433 = vector.broadcast %cst_125 : f32 to vector<8x32xf32>
    %434 = arith.addf %433, %432 : vector<8x32xf32>
    %435 = arith.divf %433, %434 : vector<8x32xf32>
    %436 = vector.extract_strided_slice %416 {offsets = [0, 64], sizes = [8, 32], strides = [1, 1]} : vector<8x128xf32> to vector<8x32xf32>
    %437 = vector.extract_strided_slice %419 {offsets = [0, 64], sizes = [8, 32], strides = [1, 1]} : vector<8x128xf32> to vector<8x32xf32>
    %438 = arith.mulf %427, %437 : vector<8x32xf32>
    %439 = arith.addf %436, %438 : vector<8x32xf32>
    %440 = math.tanh %439 : vector<8x32xf32>
    %cst_126 = arith.constant 1.000000e+00 : f32
    %441 = vector.broadcast %cst_126 : f32 to vector<8x32xf32>
    %442 = arith.subf %441, %435 : vector<8x32xf32>
    %443 = arith.mulf %442, %440 : vector<8x32xf32>
    %444 = arith.mulf %435, %413 : vector<8x32xf32>
    %445 = arith.addf %443, %444 : vector<8x32xf32>
    %c4_i32_127 = arith.constant 4 : i32
    %446 = arith.index_cast %c4_i32_127 : i32 to index
    %c0_128 = arith.constant 0 : index
    %c0_129 = arith.constant 0 : index
    %447 = vector.load %arg15[%446, %c0_128, %c0_129] : memref<8x8x128xf32, #tpu.memory_space<vmem>>, vector<1x8x128xf32>
    %448 = vector.shape_cast %447 : vector<1x8x128xf32> to vector<8x128xf32>
    %cst_130 = arith.constant dense<0.000000e+00> : vector<8x128xf32>
    %449 = tpu.matmul %445, %316, %cst_130 {dimension_numbers = #tpu.dot_dimension_numbers<[1], [0], [0], [1], [0, 0, 1, 1], [], []>} : vector<8x32xf32>, vector<32x128xf32>, vector<8x128xf32> -> vector<8x128xf32>
    %450 = vector.broadcast %317 : vector<1x128xf32> to vector<8x128xf32>
    %451 = arith.addf %449, %450 : vector<8x128xf32>
    %452 = vector.extract_strided_slice %448 {offsets = [0, 0], sizes = [8, 32], strides = [1, 1]} : vector<8x128xf32> to vector<8x32xf32>
    %453 = vector.extract_strided_slice %451 {offsets = [0, 0], sizes = [8, 32], strides = [1, 1]} : vector<8x128xf32> to vector<8x32xf32>
    %454 = arith.addf %452, %453 : vector<8x32xf32>
    %455 = arith.negf %454 : vector<8x32xf32>
    %456 = math.exp %455 : vector<8x32xf32>
    %cst_131 = arith.constant 1.000000e+00 : f32
    %457 = vector.broadcast %cst_131 : f32 to vector<8x32xf32>
    %458 = arith.addf %457, %456 : vector<8x32xf32>
    %459 = arith.divf %457, %458 : vector<8x32xf32>
    %460 = vector.extract_strided_slice %448 {offsets = [0, 32], sizes = [8, 32], strides = [1, 1]} : vector<8x128xf32> to vector<8x32xf32>
    %461 = vector.extract_strided_slice %451 {offsets = [0, 32], sizes = [8, 32], strides = [1, 1]} : vector<8x128xf32> to vector<8x32xf32>
    %462 = arith.addf %460, %461 : vector<8x32xf32>
    %463 = arith.negf %462 : vector<8x32xf32>
    %464 = math.exp %463 : vector<8x32xf32>
    %cst_132 = arith.constant 1.000000e+00 : f32
    %465 = vector.broadcast %cst_132 : f32 to vector<8x32xf32>
    %466 = arith.addf %465, %464 : vector<8x32xf32>
    %467 = arith.divf %465, %466 : vector<8x32xf32>
    %468 = vector.extract_strided_slice %448 {offsets = [0, 64], sizes = [8, 32], strides = [1, 1]} : vector<8x128xf32> to vector<8x32xf32>
    %469 = vector.extract_strided_slice %451 {offsets = [0, 64], sizes = [8, 32], strides = [1, 1]} : vector<8x128xf32> to vector<8x32xf32>
    %470 = arith.mulf %459, %469 : vector<8x32xf32>
    %471 = arith.addf %468, %470 : vector<8x32xf32>
    %472 = math.tanh %471 : vector<8x32xf32>
    %cst_133 = arith.constant 1.000000e+00 : f32
    %473 = vector.broadcast %cst_133 : f32 to vector<8x32xf32>
    %474 = arith.subf %473, %467 : vector<8x32xf32>
    %475 = arith.mulf %474, %472 : vector<8x32xf32>
    %476 = arith.mulf %467, %445 : vector<8x32xf32>
    %477 = arith.addf %475, %476 : vector<8x32xf32>
    %c5_i32_134 = arith.constant 5 : i32
    %478 = arith.index_cast %c5_i32_134 : i32 to index
    %c0_135 = arith.constant 0 : index
    %c0_136 = arith.constant 0 : index
    %479 = vector.load %arg15[%478, %c0_135, %c0_136] : memref<8x8x128xf32, #tpu.memory_space<vmem>>, vector<1x8x128xf32>
    %480 = vector.shape_cast %479 : vector<1x8x128xf32> to vector<8x128xf32>
    %cst_137 = arith.constant dense<0.000000e+00> : vector<8x128xf32>
    %481 = tpu.matmul %477, %316, %cst_137 {dimension_numbers = #tpu.dot_dimension_numbers<[1], [0], [0], [1], [0, 0, 1, 1], [], []>} : vector<8x32xf32>, vector<32x128xf32>, vector<8x128xf32> -> vector<8x128xf32>
    %482 = vector.broadcast %317 : vector<1x128xf32> to vector<8x128xf32>
    %483 = arith.addf %481, %482 : vector<8x128xf32>
    %484 = vector.extract_strided_slice %480 {offsets = [0, 0], sizes = [8, 32], strides = [1, 1]} : vector<8x128xf32> to vector<8x32xf32>
    %485 = vector.extract_strided_slice %483 {offsets = [0, 0], sizes = [8, 32], strides = [1, 1]} : vector<8x128xf32> to vector<8x32xf32>
    %486 = arith.addf %484, %485 : vector<8x32xf32>
    %487 = arith.negf %486 : vector<8x32xf32>
    %488 = math.exp %487 : vector<8x32xf32>
    %cst_138 = arith.constant 1.000000e+00 : f32
    %489 = vector.broadcast %cst_138 : f32 to vector<8x32xf32>
    %490 = arith.addf %489, %488 : vector<8x32xf32>
    %491 = arith.divf %489, %490 : vector<8x32xf32>
    %492 = vector.extract_strided_slice %480 {offsets = [0, 32], sizes = [8, 32], strides = [1, 1]} : vector<8x128xf32> to vector<8x32xf32>
    %493 = vector.extract_strided_slice %483 {offsets = [0, 32], sizes = [8, 32], strides = [1, 1]} : vector<8x128xf32> to vector<8x32xf32>
    %494 = arith.addf %492, %493 : vector<8x32xf32>
    %495 = arith.negf %494 : vector<8x32xf32>
    %496 = math.exp %495 : vector<8x32xf32>
    %cst_139 = arith.constant 1.000000e+00 : f32
    %497 = vector.broadcast %cst_139 : f32 to vector<8x32xf32>
    %498 = arith.addf %497, %496 : vector<8x32xf32>
    %499 = arith.divf %497, %498 : vector<8x32xf32>
    %500 = vector.extract_strided_slice %480 {offsets = [0, 64], sizes = [8, 32], strides = [1, 1]} : vector<8x128xf32> to vector<8x32xf32>
    %501 = vector.extract_strided_slice %483 {offsets = [0, 64], sizes = [8, 32], strides = [1, 1]} : vector<8x128xf32> to vector<8x32xf32>
    %502 = arith.mulf %491, %501 : vector<8x32xf32>
    %503 = arith.addf %500, %502 : vector<8x32xf32>
    %504 = math.tanh %503 : vector<8x32xf32>
    %cst_140 = arith.constant 1.000000e+00 : f32
    %505 = vector.broadcast %cst_140 : f32 to vector<8x32xf32>
    %506 = arith.subf %505, %499 : vector<8x32xf32>
    %507 = arith.mulf %506, %504 : vector<8x32xf32>
    %508 = arith.mulf %499, %477 : vector<8x32xf32>
    %509 = arith.addf %507, %508 : vector<8x32xf32>
    %c6_i32_141 = arith.constant 6 : i32
    %510 = arith.index_cast %c6_i32_141 : i32 to index
    %c0_142 = arith.constant 0 : index
    %c0_143 = arith.constant 0 : index
    %511 = vector.load %arg15[%510, %c0_142, %c0_143] : memref<8x8x128xf32, #tpu.memory_space<vmem>>, vector<1x8x128xf32>
    %512 = vector.shape_cast %511 : vector<1x8x128xf32> to vector<8x128xf32>
    %cst_144 = arith.constant dense<0.000000e+00> : vector<8x128xf32>
    %513 = tpu.matmul %509, %316, %cst_144 {dimension_numbers = #tpu.dot_dimension_numbers<[1], [0], [0], [1], [0, 0, 1, 1], [], []>} : vector<8x32xf32>, vector<32x128xf32>, vector<8x128xf32> -> vector<8x128xf32>
    %514 = vector.broadcast %317 : vector<1x128xf32> to vector<8x128xf32>
    %515 = arith.addf %513, %514 : vector<8x128xf32>
    %516 = vector.extract_strided_slice %512 {offsets = [0, 0], sizes = [8, 32], strides = [1, 1]} : vector<8x128xf32> to vector<8x32xf32>
    %517 = vector.extract_strided_slice %515 {offsets = [0, 0], sizes = [8, 32], strides = [1, 1]} : vector<8x128xf32> to vector<8x32xf32>
    %518 = arith.addf %516, %517 : vector<8x32xf32>
    %519 = arith.negf %518 : vector<8x32xf32>
    %520 = math.exp %519 : vector<8x32xf32>
    %cst_145 = arith.constant 1.000000e+00 : f32
    %521 = vector.broadcast %cst_145 : f32 to vector<8x32xf32>
    %522 = arith.addf %521, %520 : vector<8x32xf32>
    %523 = arith.divf %521, %522 : vector<8x32xf32>
    %524 = vector.extract_strided_slice %512 {offsets = [0, 32], sizes = [8, 32], strides = [1, 1]} : vector<8x128xf32> to vector<8x32xf32>
    %525 = vector.extract_strided_slice %515 {offsets = [0, 32], sizes = [8, 32], strides = [1, 1]} : vector<8x128xf32> to vector<8x32xf32>
    %526 = arith.addf %524, %525 : vector<8x32xf32>
    %527 = arith.negf %526 : vector<8x32xf32>
    %528 = math.exp %527 : vector<8x32xf32>
    %cst_146 = arith.constant 1.000000e+00 : f32
    %529 = vector.broadcast %cst_146 : f32 to vector<8x32xf32>
    %530 = arith.addf %529, %528 : vector<8x32xf32>
    %531 = arith.divf %529, %530 : vector<8x32xf32>
    %532 = vector.extract_strided_slice %512 {offsets = [0, 64], sizes = [8, 32], strides = [1, 1]} : vector<8x128xf32> to vector<8x32xf32>
    %533 = vector.extract_strided_slice %515 {offsets = [0, 64], sizes = [8, 32], strides = [1, 1]} : vector<8x128xf32> to vector<8x32xf32>
    %534 = arith.mulf %523, %533 : vector<8x32xf32>
    %535 = arith.addf %532, %534 : vector<8x32xf32>
    %536 = math.tanh %535 : vector<8x32xf32>
    %cst_147 = arith.constant 1.000000e+00 : f32
    %537 = vector.broadcast %cst_147 : f32 to vector<8x32xf32>
    %538 = arith.subf %537, %531 : vector<8x32xf32>
    %539 = arith.mulf %538, %536 : vector<8x32xf32>
    %540 = arith.mulf %531, %509 : vector<8x32xf32>
    %541 = arith.addf %539, %540 : vector<8x32xf32>
    %c7_i32_148 = arith.constant 7 : i32
    %542 = arith.index_cast %c7_i32_148 : i32 to index
    %c0_149 = arith.constant 0 : index
    %c0_150 = arith.constant 0 : index
    %543 = vector.load %arg15[%542, %c0_149, %c0_150] : memref<8x8x128xf32, #tpu.memory_space<vmem>>, vector<1x8x128xf32>
    %544 = vector.shape_cast %543 : vector<1x8x128xf32> to vector<8x128xf32>
    %cst_151 = arith.constant dense<0.000000e+00> : vector<8x128xf32>
    %545 = tpu.matmul %541, %316, %cst_151 {dimension_numbers = #tpu.dot_dimension_numbers<[1], [0], [0], [1], [0, 0, 1, 1], [], []>} : vector<8x32xf32>, vector<32x128xf32>, vector<8x128xf32> -> vector<8x128xf32>
    %546 = vector.broadcast %317 : vector<1x128xf32> to vector<8x128xf32>
    %547 = arith.addf %545, %546 : vector<8x128xf32>
    %548 = vector.extract_strided_slice %544 {offsets = [0, 0], sizes = [8, 32], strides = [1, 1]} : vector<8x128xf32> to vector<8x32xf32>
    %549 = vector.extract_strided_slice %547 {offsets = [0, 0], sizes = [8, 32], strides = [1, 1]} : vector<8x128xf32> to vector<8x32xf32>
    %550 = arith.addf %548, %549 : vector<8x32xf32>
    %551 = arith.negf %550 : vector<8x32xf32>
    %552 = math.exp %551 : vector<8x32xf32>
    %cst_152 = arith.constant 1.000000e+00 : f32
    %553 = vector.broadcast %cst_152 : f32 to vector<8x32xf32>
    %554 = arith.addf %553, %552 : vector<8x32xf32>
    %555 = arith.divf %553, %554 : vector<8x32xf32>
    %556 = vector.extract_strided_slice %544 {offsets = [0, 32], sizes = [8, 32], strides = [1, 1]} : vector<8x128xf32> to vector<8x32xf32>
    %557 = vector.extract_strided_slice %547 {offsets = [0, 32], sizes = [8, 32], strides = [1, 1]} : vector<8x128xf32> to vector<8x32xf32>
    %558 = arith.addf %556, %557 : vector<8x32xf32>
    %559 = arith.negf %558 : vector<8x32xf32>
    %560 = math.exp %559 : vector<8x32xf32>
    %cst_153 = arith.constant 1.000000e+00 : f32
    %561 = vector.broadcast %cst_153 : f32 to vector<8x32xf32>
    %562 = arith.addf %561, %560 : vector<8x32xf32>
    %563 = arith.divf %561, %562 : vector<8x32xf32>
    %564 = vector.extract_strided_slice %544 {offsets = [0, 64], sizes = [8, 32], strides = [1, 1]} : vector<8x128xf32> to vector<8x32xf32>
    %565 = vector.extract_strided_slice %547 {offsets = [0, 64], sizes = [8, 32], strides = [1, 1]} : vector<8x128xf32> to vector<8x32xf32>
    %566 = arith.mulf %555, %565 : vector<8x32xf32>
    %567 = arith.addf %564, %566 : vector<8x32xf32>
    %568 = math.tanh %567 : vector<8x32xf32>
    %cst_154 = arith.constant 1.000000e+00 : f32
    %569 = vector.broadcast %cst_154 : f32 to vector<8x32xf32>
    %570 = arith.subf %569, %563 : vector<8x32xf32>
    %571 = arith.mulf %570, %568 : vector<8x32xf32>
    %572 = arith.mulf %563, %541 : vector<8x32xf32>
    %573 = arith.addf %571, %572 : vector<8x32xf32>
    %c8_i32_155 = arith.constant 8 : i32
    %c0_156 = arith.constant 0 : index
    %c0_157 = arith.constant 0 : index
    %574 = vector.load %arg12[%c0_156, %c0_157] : memref<32x128xf32, #tpu.memory_space<vmem>>, vector<32x128xf32>
    %cst_158 = arith.constant dense<0.000000e+00> : vector<8x128xf32>
    %575 = tpu.matmul %573, %574, %cst_158 {dimension_numbers = #tpu.dot_dimension_numbers<[1], [0], [0], [1], [0, 0, 1, 1], [], []>} : vector<8x32xf32>, vector<32x128xf32>, vector<8x128xf32> -> vector<8x128xf32>
    %c0_159 = arith.constant 0 : index
    %c0_160 = arith.constant 0 : index
    %576 = vector.load %arg13[%c0_159, %c0_160] : memref<1x128xf32, #tpu.memory_space<vmem>>, vector<1x128xf32>
    %577 = vector.broadcast %576 : vector<1x128xf32> to vector<8x128xf32>
    %578 = arith.addf %575, %577 : vector<8x128xf32>
    %c0_161 = arith.constant 0 : index
    %c0_162 = arith.constant 0 : index
    %579 = vector.load %arg14[%c0_161, %c0_162] : memref<8x128xf32, #tpu.memory_space<vmem>>, vector<8x128xf32>
    tpu.vector_store %arg14[%c0_161, %c0_162], %578 {strides = array<i32>} : memref<8x128xf32, #tpu.memory_space<vmem>>, vector<8x128xf32>,
    return
  }
  func.func @transform_0(%arg0: i32) -> (i32, i32, i32) {
    %c0_i32 = arith.constant 0 : i32
    %c0_i32_0 = arith.constant 0 : i32
    %c0_i32_1 = arith.constant 0 : i32
    return %c0_i32, %arg0, %c0_i32_0 : i32, i32, i32
  }
  func.func @transform_1(%arg0: i32) -> (i32, i32) {
    %c0_i32 = arith.constant 0 : i32
    %c0_i32_0 = arith.constant 0 : i32
    %c0_i32_1 = arith.constant 0 : i32
    return %c0_i32, %c0_i32_0 : i32, i32
  }
  func.func @transform_2(%arg0: i32) -> (i32, i32) {
    %c0_i32 = arith.constant 0 : i32
    %c0_i32_0 = arith.constant 0 : i32
    %c0_i32_1 = arith.constant 0 : i32
    return %c0_i32, %c0_i32_0 : i32, i32
  }
  func.func @transform_3(%arg0: i32) -> (i32, i32) {
    %c0_i32 = arith.constant 0 : i32
    %c0_i32_0 = arith.constant 0 : i32
    %c0_i32_1 = arith.constant 0 : i32
    return %c0_i32, %c0_i32_0 : i32, i32
  }
  func.func @transform_4(%arg0: i32) -> (i32, i32) {
    %c0_i32 = arith.constant 0 : i32
    %c0_i32_0 = arith.constant 0 : i32
    %c0_i32_1 = arith.constant 0 : i32
    return %c0_i32, %c0_i32_0 : i32, i32
  }
  func.func @transform_5(%arg0: i32) -> (i32, i32) {
    %c0_i32 = arith.constant 0 : i32
    %c0_i32_0 = arith.constant 0 : i32
    %c0_i32_1 = arith.constant 0 : i32
    return %c0_i32, %c0_i32_0 : i32, i32
  }
  func.func @transform_6(%arg0: i32) -> (i32, i32) {
    %c0_i32 = arith.constant 0 : i32
    %c0_i32_0 = arith.constant 0 : i32
    %c0_i32_1 = arith.constant 0 : i32
    return %c0_i32, %c0_i32_0 : i32, i32
  }
  func.func @transform_7(%arg0: i32) -> (i32, i32) {
    %c0_i32 = arith.constant 0 : i32
    %c0_i32_0 = arith.constant 0 : i32
    %c0_i32_1 = arith.constant 0 : i32
    return %c0_i32, %c0_i32_0 : i32, i32
  }
  func.func @transform_8(%arg0: i32) -> (i32, i32) {
    %c0_i32 = arith.constant 0 : i32
    %c0_i32_0 = arith.constant 0 : i32
    %c0_i32_1 = arith.constant 0 : i32
    return %c0_i32, %c0_i32_0 : i32, i32
  }
  func.func @transform_9(%arg0: i32) -> (i32, i32) {
    %c0_i32 = arith.constant 0 : i32
    %c0_i32_0 = arith.constant 0 : i32
    %c0_i32_1 = arith.constant 0 : i32
    return %c0_i32, %c0_i32_0 : i32, i32
  }
  func.func @transform_10(%arg0: i32) -> (i32, i32) {
    %c0_i32 = arith.constant 0 : i32
    %c0_i32_0 = arith.constant 0 : i32
    %c0_i32_1 = arith.constant 0 : i32
    return %c0_i32, %c0_i32_0 : i32, i32
  }
  func.func @transform_11(%arg0: i32) -> (i32, i32) {
    %c0_i32 = arith.constant 0 : i32
    %c0_i32_0 = arith.constant 0 : i32
    %c0_i32_1 = arith.constant 0 : i32
    return %c0_i32, %c0_i32_0 : i32, i32
  }
  func.func @transform_12(%arg0: i32) -> (i32, i32) {
    %c0_i32 = arith.constant 0 : i32
    %c0_i32_0 = arith.constant 0 : i32
    %c0_i32_1 = arith.constant 0 : i32
    return %c0_i32, %c0_i32_0 : i32, i32
  }
  func.func @transform_13(%arg0: i32) -> (i32, i32) {
    %c0_i32 = arith.constant 0 : i32
    %c0_i32_0 = arith.constant 0 : i32
    return %arg0, %c0_i32 : i32, i32
  }
}

</mosaic_0001>

<bundles_post_ra>
// kernel: hitnet_forward.1
= control target key start
LH: loop header
LB: loop body
LE: loop exit
PB: predicated region body
PF: predicated region fallthrough
CT: control target
= control target key end

     0   :  { %vm58_vm0 = vcmask 130048   ;;  %v1585_v8 = vmov 0.0   ;;  %vm140_vm1 = vcmask 261120   ;;  %s1587_s18 = smov 96   ;;  %s2027_s1 = inlined_call_operand.vmem [shape: f32[16,32], index: 1, kind: input, shape index: {}]   ;;  %s2028_s0 = inlined_call_operand.vmem [shape: f32[8,8,16], index: 0, kind: input, shape index: {}]   ;;  %s2029_s4 = inlined_call_operand.vmem [shape: f32[32,128], index: 4, kind: input, shape index: {}]   ;;  %s2030_s3 = inlined_call_operand.vmem [shape: f32[32,128], index: 3, kind: input, shape index: {}]   ;;  %s2031_s2 = inlined_call_operand.vmem [shape: f32[1,32], index: 2, kind: input, shape index: {}]   ;;  %s2032_s6 = inlined_call_operand.vmem [shape: f32[1,128], index: 6, kind: input, shape index: {}]   ;;  %s2033_s5 = inlined_call_operand.vmem [shape: f32[1,128], index: 5, kind: input, shape index: {}]   ;;  %s2034_s7 = inlined_call_operand.vmem [shape: f32[32,128], index: 7, kind: input, shape index: {}]   ;;  %s2035_s9 = inlined_call_operand.vmem [shape: f32[1,128], index: 9, kind: input, shape index: {}]   ;;  %s2036_s8 = inlined_call_operand.vmem [shape: f32[32,128], index: 8, kind: input, shape index: {}]   ;;  %s2037_s10 = inlined_call_operand.vmem [shape: f32[1,128], index: 10, kind: input, shape index: {}]   ;;  %s2038_s11 = inlined_call_operand.vmem [shape: f32[32,128], index: 11, kind: input, shape index: {}]   ;;  %s2039_s12 = inlined_call_operand.vmem [shape: f32[1,128], index: 12, kind: input, shape index: {}]   ;;  %s2040_s13 = inlined_call_operand.vmem [shape: f32[8,128], index: 13, kind: output, shape index: {}]  }
   0x1   :  { %v53_v0 = vld [vmem:[%s2027_s1 + $0x8] sm:$0xff]  ;;  %v52_v1 = vld [vmem:[%s2027_s1] sm:$0xff]  ;;  %v1670_v3 = vld [vmem:[%s2029_s4 + $0x18] sm:$0xff] }
   0x2   :  { %97 = vmatpush.msra.mxu0 %v53_v0  ;;  %v44_v2 = vld [vmem:[%s2028_s0] sm:$0xff]  ;;  %v1675_v4 = vld [vmem:[%s2029_s4 + $0x10] sm:$0xff]  ;;  %238 = vmatpush.msra.mxu3 %v1670_v3  ;;  %v135_v5 = vld [vmem:[%s2030_s3 + $0x18] sm:$0xff] }
   0x3   :  { %513 = vmatpush.msra.mxu2 %v1670_v3  ;;  %v1685_v6 = vld [vmem:[%s2029_s4 + $0x8] sm:$0xff]  ;;  %177 = vmatpush.msra.mxu1 %v135_v5  ;;  %v1692_v7 = vld [vmem:[%s2029_s4] sm:$0xff]  ;;  %v134_v9 = vld [vmem:[%s2030_s3 + $0x10] sm:$0xff] }
   0x4   :  { %98 = vmatpush.msra.mxu0 %v52_v1  ;;  %239 = vmatpush.msra.mxu3 %v1675_v4  ;;  %v133_v10 = vld [vmem:[%s2030_s3 + $0x8] sm:$0xff]  ;;  %v132_v11 = vld [vmem:[%s2030_s3] sm:$0xff]  ;;  %s1586_s3 = smov 64  }
   0x5   :  { %1423 = vmatmul.msk.f32.vlgmr.msra.gmra.mxu0 %vm58_vm0, %v44_v2  ;;  %514 = vmatpush.msra.mxu2 %v1675_v4  ;;  %v1728_v12 = vld [vmem:[%s2031_s2] ss:$0 sm:$0xff]  ;;  %v45_v38 = vld [vmem:[%s2028_s0 + $0x8] sm:$0xff] }
   0x6   :  { %375 = vmatpush.msrb.mxu0 %v1670_v3  ;;  %240 = vmatpush.msra.mxu3 %v1685_v6  ;;  %v1735_v16 = vld [vmem:[%s2032_s6] ss:$0 sm:$0xff] }
   0x7   :  { %515 = vmatpush.msra.mxu2 %v1685_v6  ;;  %178 = vmatpush.msra.mxu1 %v134_v9  ;;  %v1742_v19 = vld [vmem:[%s2033_s5] ss:$0 sm:$0xff] }
   0x8   :  { %376 = vmatpush.msrb.mxu0 %v1675_v4  ;;  %241 = vmatpush.msra.mxu3 %v1692_v7 }
   0x9   :  { %242 = vmatmul.f32.vlgmr.msra.gmra.mxu3 %v1585_v8  ;;  %516 = vmatpush.msra.mxu2 %v1692_v7 }
   0xa   :  { %377 = vmatpush.msrb.mxu0 %v1685_v6  ;;  %306 = vmatpush.msrb.mxu3 %v1670_v3 }
   0xb   :  { %651 = vmatpush.msrb.mxu2 %v1670_v3  ;;  %179 = vmatpush.msra.mxu1 %v133_v10 }
   0xc   :  { %378 = vmatpush.msrb.mxu0 %v1692_v7  ;;  %307 = vmatpush.msrb.mxu3 %v1675_v4 }
   0xd   :  { %652 = vmatpush.msrb.mxu2 %v1675_v4  ;;  %180 = vmatpush.msra.mxu1 %v132_v11 }
   0xe   :  { %308 = vmatpush.msrb.mxu3 %v1685_v6  ;;  %1424 = vmatmul.msk.f32.gmra.mxu0 %vm58_vm0, %v45_v38 }
   0xf   :  { %653 = vmatpush.msrb.mxu2 %v1685_v6 }
  0x10   :  { %309 = vmatpush.msrb.mxu3 %v1692_v7 }
  0x11   :  { %654 = vmatpush.msrb.mxu2 %v1692_v7 }
  0x12   :  { %444 = vmatpush.msra.mxu3 %v1670_v3 }
  0x14   :  { %445 = vmatpush.msra.mxu3 %v1675_v4 }
  0x16   :  { %446 = vmatpush.msra.mxu3 %v1685_v6 }
  0x18   :  { %447 = vmatpush.msra.mxu3 %v1692_v7 }
  0x82   :  { %v100_v13 = vpop.f32.mrf.mxu0 }
  0x83   :  { %v101_v14 = vadd.f32 %v1728_v12, %v100_v13  ;;  %v46_v13 = vld [vmem:[%s2028_s0 + $0x10] sm:$0xff] }
  0x84   :  { %1425 = vmatmul.msk.f32.gmra.mxu0 %vm58_vm0, %v46_v13 }
  0x85   :  { %v124_v15 = vmax.f32 %v101_v14, 0.0 }
  0x87   :  { %1431 = vmatmul.msk.f32.vlgmr.msra.gmra.mxu1 %vm140_vm1, %v124_v15 }
  0x8b   :  { %v103_v47 = vpop.f32.mrf.mxu0 }
  0x8c   :  { %v243_v17 = vpop.f32.mrf.mxu3  ;;  %v104_v48 = vadd.f32 %v1728_v12, %v103_v47 }
  0x8d   :  { %v244_v18 = vadd.f32 %v1735_v16, %v243_v17 }
  0x8e   :  { %v125_v49 = vmax.f32 %v104_v48, 0.0 }
  0x8f   :  { %267 = vrot.lane.b32.xlu0 %v244_v18, %s1586_s3 }
  0x90   :  { %1432 = vmatmul.msk.f32.gmra.mxu1 %vm140_vm1, %v125_v49 }
 0x101   :  { %v268_v33 = vpop.permute.xlu0 %267 }
 0x104   :  { %v182_v20 = vpop.f32.mrf.mxu1 }
 0x105   :  { %v183_v21 = vadd.f32 %v1742_v19, %v182_v20  ;;  %v48_v20 = vld [vmem:[%s2028_s0 + $0x20] sm:$0xff] }
 0x107   :  { %v246_v22 = vadd.f32 %v244_v18, %v183_v21  ;;  %v47_v18 = vld [vmem:[%s2028_s0 + $0x18] sm:$0xff] }
 0x108   :  { %1426 = vmatmul.msk.f32.gmra.mxu0 %vm58_vm0, %v47_v18 }
 0x109   :  { %v1439_v23 = vmul.f32 -1.442695, %v246_v22 }
 0x10b   :  { %1487 = vpow2.f32 %v1439_v23 }
 0x10d   :  { %v185_v53 = vpop.f32.mrf.mxu1 }
 0x10e   :  { %v186_v54 = vadd.f32 %v1742_v19, %v185_v53 }
 0x110   :  { %1427 = vmatmul.msk.f32.gmra.mxu0 %vm58_vm0, %v48_v20 }
 0x111   :  { %v1488_v24 = vpop.eup %1487 }
 0x112   :  { %v250_v25 = vadd.f32 1.0, %v1488_v24  ;;  %v49_v24 = vld [vmem:[%s2028_s0 + $0x28] sm:$0xff] }
 0x114   :  { %1489 = vrcp.f32 %v250_v25  ;;  %v262_v29 = vand.u32 2147483648, %v250_v25  ;;  %v260_v31 = vand.u32 2147483647, %v250_v25  ;;  %vm256_vm3 = vweird.f32 %v250_v25 }
 0x116   :  { %v263_v34 = vor.u32 1.1754944e-38, %v262_v29  ;;  %vm261_vm5 = vcmp.eq.f32.partialorder %v260_v31, 8.507059e+37  ;;  %v51_v31 = vld [vmem:[%s2028_s0 + $0x38] sm:$0xff] }
 0x118   :  { %1428 = vmatmul.msk.f32.gmra.mxu0 %vm58_vm0, %v49_v24 }
 0x11a   :  { %v1490_v26 = vpop.eup %1489 }
 0x11b   :  { %v252_v27 = vmul.f32 %v1490_v26, %v250_v25  ;;  %vm257_vm2 = vweird.f32 %v1490_v26  ;;  %v50_v25 = vld [vmem:[%s2028_s0 + $0x30] sm:$0xff] }
 0x11c   :  { %vm258_vm4 = vmor %vm256_vm3, %vm257_vm2 }
 0x11d   :  { %v253_v28 = vsub.f32 1.0, %v252_v27 }
 0x11f   :  { %v254_v30 = vmul.f32 %v1490_v26, %v253_v28 }
 0x120   :  { %1429 = vmatmul.msk.f32.gmra.mxu0 %vm58_vm0, %v50_v25 }
 0x121   :  { %v255_v32 = vadd.f32 %v1490_v26, %v254_v30 }
 0x123   :  { %v259_v35 = vsel %vm258_vm4, %v1490_v26, %v255_v32 }
 0x124   :  { %v264_v36 = vsel %vm261_vm5, %v263_v34, %v259_v35 }
 0x125   :  { %v270_v37 = vmul.f32 %v268_v33, %v264_v36  ;;  %v277_v42 = vsub.f32 1.0, %v264_v36  ;;  %v283_v44 = vmul.f32 0.0, %v264_v36 }
 0x127   :  { %272 = vrot.lane.b32.xlu0 %v270_v37, %s1586_s3 }
 0x128   :  { %1430 = vmatmul.msk.f32.gmra.mxu0 %vm58_vm0, %v51_v31 }
 0x199   :  { %v273_v39 = vpop.permute.xlu0 %272 }
 0x19a   :  { %v275_v40 = vadd.f32 %v273_v39, %v183_v21  ;;  %v106_v21 = vpop.f32.mrf.mxu0 }
 0x19b   :  { %v107_v22 = vadd.f32 %v1728_v12, %v106_v21 }
 0x19c   :  { %1491 = vtanh.f32 %v275_v40 }
 0x19d   :  { %v126_v23 = vmax.f32 %v107_v22, 0.0 }
 0x19f   :  { %1433 = vmatmul.msk.f32.gmra.mxu1 %vm140_vm1, %v126_v23 }
 0x1a2   :  { %v1492_v41 = vpop.eup %1491  ;;  %v109_v32 = vpop.f32.mrf.mxu0 }
 0x1a3   :  { %279 = vrot.lane.b32.xlu1 %v1492_v41, %s1587_s18  ;;  %v110_v33 = vadd.f32 %v1728_v12, %v109_v32 }
 0x1a5   :  { %v127_v34 = vmax.f32 %v110_v33, 0.0 }
 0x1a7   :  { %1434 = vmatmul.msk.f32.gmra.mxu1 %vm140_vm1, %v127_v34 }
 0x1aa   :  { %v112_v35 = vpop.f32.mrf.mxu0 }
 0x1ab   :  { %v113_v36 = vadd.f32 %v1728_v12, %v112_v35 }
 0x1ad   :  { %v128_v37 = vmax.f32 %v113_v36, 0.0 }
 0x1af   :  { %1435 = vmatmul.msk.f32.gmra.mxu1 %vm140_vm1, %v128_v37 }
 0x1b2   :  { %v115_v38 = vpop.f32.mrf.mxu0 }
 0x1b3   :  { %v116_v39 = vadd.f32 %v1728_v12, %v115_v38 }
 0x1b5   :  { %v129_v40 = vmax.f32 %v116_v39, 0.0 }
 0x1b7   :  { %1436 = vmatmul.msk.f32.gmra.mxu1 %vm140_vm1, %v129_v40 }
 0x215   :  { %v280_v43 = vpop.permute.xlu1 %279 }
 0x216   :  { %v282_v45 = vmul.f32 %v280_v43, %v277_v42  ;;  %v118_v42 = vpop.f32.mrf.mxu0 }
 0x217   :  { %v119_v43 = vadd.f32 %v1728_v12, %v118_v42 }
 0x218   :  { %v284_v46 = vadd.f32 %v283_v44, %v282_v45 }
 0x219   :  { %v130_v44 = vmax.f32 %v119_v43, 0.0 }
 0x21a   :  { %286 = vrot.lane.b32.xlu1 %v284_v46, %s1587_s18 }
 0x21b   :  { %1437 = vmatmul.msk.f32.gmra.mxu1 %vm140_vm1, %v130_v44 }
 0x21e   :  { %v121_v45 = vpop.f32.mrf.mxu0 }
 0x28c   :  { %v287_v50 = vpop.permute.xlu1 %286 }
 0x28d   :  { %289 = vst.msk [vmem:[#allocation3] sm:$0xff] %vm140_vm1, %v287_v50  ;;  %1440 = vmatmul.msk.f32.vlgmr.msrb.gmra.mxu3 %vm140_vm1, %v287_v50  ;;  %v188_v50 = vpop.f32.mrf.mxu1 }
 0x28e   :  { %582 = vmatpush.msrb.mxu3 %v1670_v3 }
 0x290   :  { %583 = vmatpush.msrb.mxu3 %v1675_v4 }
 0x292   :  { %584 = vmatpush.msrb.mxu3 %v1685_v6 }
 0x294   :  { %585 = vmatpush.msrb.mxu3 %v1692_v7 }
 0x295   :  { %v191_v22 = vpop.f32.mrf.mxu1 }
 0x296   :  { %v192_v23 = vadd.f32 %v1742_v19, %v191_v22 }
 0x310   :  { %v311_v51 = vpop.f32.mrf.mxu3 }
 0x311   :  { %v312_v52 = vadd.f32 %v1735_v16, %v311_v51  ;;  %v189_v51 = vadd.f32 %v1742_v19, %v188_v50 }
 0x313   :  { %335 = vrot.lane.b32.xlu2 %v312_v52, %s1586_s3  ;;  %v314_v55 = vadd.f32 %v312_v52, %v186_v54 }
 0x315   :  { %v1441_v56 = vmul.f32 -1.442695, %v314_v55 }
 0x317   :  { %1493 = vpow2.f32 %v1441_v56 }
 0x31d   :  { %v1494_v57 = vpop.eup %1493 }
 0x31e   :  { %v318_v58 = vadd.f32 1.0, %v1494_v57 }
 0x320   :  { %1495 = vrcp.f32 %v318_v58  ;;  %v330_v0 = vand.u32 2147483648, %v318_v58  ;;  %vm324_vm7 = vweird.f32 %v318_v58  ;;  %v328_v1 = vand.u32 2147483647, %v318_v58 }
 0x322   :  { %v331_v5 = vor.u32 1.1754944e-38, %v330_v0  ;;  %vm329_vm9 = vcmp.eq.f32.partialorder %v328_v1, 8.507059e+37 }
 0x326   :  { %v1496_v59 = vpop.eup %1495 }
 0x327   :  { %v320_v60 = vmul.f32 %v1496_v59, %v318_v58  ;;  %vm325_vm6 = vweird.f32 %v1496_v59 }
 0x328   :  { %vm326_vm8 = vmor %vm324_vm7, %vm325_vm6 }
 0x329   :  { %v321_v61 = vsub.f32 1.0, %v320_v60 }
 0x32b   :  { %v322_v62 = vmul.f32 %v1496_v59, %v321_v61 }
 0x32d   :  { %v323_v63 = vadd.f32 %v1496_v59, %v322_v62 }
 0x32f   :  { %v327_v2 = vsel %vm326_vm8, %v1496_v59, %v323_v63 }
 0x330   :  { %v332_v10 = vsel %vm329_vm9, %v331_v5, %v327_v2 }
 0x331   :  { %v345_v26 = vsub.f32 1.0, %v332_v10  ;;  %v351_v28 = vmul.f32 %v332_v10, %v284_v46  ;;  %v122_v46 = vadd.f32 %v1728_v12, %v121_v45 }
 0x333   :  { %v131_v47 = vmax.f32 %v122_v46, 0.0 }
 0x335   :  { %1438 = vmatmul.msk.f32.gmra.mxu1 %vm140_vm1, %v131_v47  ;;  %v194_v47 = vpop.f32.mrf.mxu1 }
 0x36d   :  { %v336_v9 = vpop.permute.xlu2 %335 }
 0x36e   :  { %v338_v11 = vmul.f32 %v336_v9, %v332_v10 }
 0x370   :  { %340 = vrot.lane.b32.xlu2 %v338_v11, %s1586_s3 }
 0x3ca   :  { %v341_v14 = vpop.permute.xlu2 %340 }
 0x3cb   :  { %v343_v15 = vadd.f32 %v341_v14, %v186_v54 }
 0x3cd   :  { %1497 = vtanh.f32 %v343_v15 }
 0x3d3   :  { %v1498_v17 = vpop.eup %1497 }
 0x3d4   :  { %347 = vrot.lane.b32.xlu0 %v1498_v17, %s1587_s18 }
 0x446   :  { %v348_v27 = vpop.permute.xlu0 %347 }
 0x447   :  { %v350_v29 = vmul.f32 %v348_v27, %v345_v26 }
 0x449   :  { %v352_v30 = vadd.f32 %v351_v28, %v350_v29 }
 0x44b   :  { %354 = vrot.lane.b32.xlu1 %v352_v30, %s1587_s18 }
 0x4bd   :  { %v355_v41 = vpop.permute.xlu1 %354 }
 0x4be   :  { %358 = vst.msk [vmem:[#allocation3 + $0x8] sm:$0xff] %vm140_vm1, %v355_v41  ;;  %1442 = vmatmul.msk.f32.vlgmr.msrb.gmra.mxu0 %vm140_vm1, %v355_v41 }
 0x53b   :  { %v380_v48 = vpop.f32.mrf.mxu0 }
 0x53c   :  { %v381_v49 = vadd.f32 %v1735_v16, %v380_v48  ;;  %v195_v48 = vadd.f32 %v1742_v19, %v194_v47  ;;  %v774_v47 = vld [vmem:[#allocation3 + $0x8] sm:$0xff] }
 0x53e   :  { %404 = vrot.lane.b32.xlu2 %v381_v49, %s1586_s3  ;;  %v383_v52 = vadd.f32 %v381_v49, %v189_v51 }
 0x540   :  { %v1443_v53 = vmul.f32 -1.442695, %v383_v52 }
 0x542   :  { %1499 = vpow2.f32 %v1443_v53 }
 0x548   :  { %v1500_v54 = vpop.eup %1499 }
 0x549   :  { %v387_v55 = vadd.f32 1.0, %v1500_v54 }
 0x54b   :  { %1501 = vrcp.f32 %v387_v55  ;;  %v399_v60 = vand.u32 2147483648, %v387_v55  ;;  %vm393_vm11 = vweird.f32 %v387_v55  ;;  %v397_v61 = vand.u32 2147483647, %v387_v55 }
 0x54d   :  { %v400_v63 = vor.u32 1.1754944e-38, %v399_v60  ;;  %vm398_vm13 = vcmp.eq.f32.partialorder %v397_v61, 8.507059e+37 }
 0x551   :  { %v1502_v56 = vpop.eup %1501 }
 0x552   :  { %v389_v57 = vmul.f32 %v1502_v56, %v387_v55  ;;  %vm394_vm10 = vweird.f32 %v1502_v56 }
 0x553   :  { %vm395_vm12 = vmor %vm393_vm11, %vm394_vm10 }
 0x554   :  { %v390_v12 = vsub.f32 1.0, %v389_v57 }
 0x556   :  { %v391_v58 = vmul.f32 %v1502_v56, %v390_v12 }
 0x558   :  { %v392_v59 = vadd.f32 %v1502_v56, %v391_v58 }
 0x55a   :  { %v396_v62 = vsel %vm395_vm12, %v1502_v56, %v392_v59 }
 0x55b   :  { %v401_v1 = vsel %vm398_vm13, %v400_v63, %v396_v62 }
 0x55c   :  { %v414_v11 = vsub.f32 1.0, %v401_v1  ;;  %v420_v14 = vmul.f32 %v401_v1, %v352_v30 }
 0x598   :  { %v405_v0 = vpop.permute.xlu2 %404 }
 0x599   :  { %v407_v2 = vmul.f32 %v405_v0, %v401_v1 }
 0x59b   :  { %409 = vrot.lane.b32.xlu0 %v407_v2, %s1586_s3 }
 0x60d   :  { %v410_v5 = vpop.permute.xlu0 %409 }
 0x60e   :  { %v412_v9 = vadd.f32 %v410_v5, %v189_v51 }
 0x610   :  { %1503 = vtanh.f32 %v412_v9 }
 0x616   :  { %v1504_v10 = vpop.eup %1503 }
 0x617   :  { %416 = vrot.lane.b32.xlu1 %v1504_v10, %s1587_s18 }
 0x689   :  { %v417_v13 = vpop.permute.xlu1 %416 }
 0x68a   :  { %v419_v15 = vmul.f32 %v417_v13, %v414_v11 }
 0x68c   :  { %v421_v17 = vadd.f32 %v420_v14, %v419_v15 }
 0x68e   :  { %423 = vrot.lane.b32.xlu2 %v421_v17, %s1587_s18 }
 0x6e8   :  { %v424_v18 = vpop.permute.xlu2 %423 }
 0x6e9   :  { %427 = vst.msk [vmem:[#allocation3 + $0x10] sm:$0xff] %vm140_vm1, %v424_v18  ;;  %1444 = vmatmul.msk.f32.vlgmr.msra.gmra.mxu3 %vm140_vm1, %v424_v18  ;;  %v197_v18 = vpop.f32.mrf.mxu1 }
 0x6ea   :  { %720 = vmatpush.msra.mxu3 %v1670_v3 }
 0x6ec   :  { %721 = vmatpush.msra.mxu3 %v1675_v4 }
 0x6ee   :  { %722 = vmatpush.msra.mxu3 %v1685_v6 }
 0x6f0   :  { %723 = vmatpush.msra.mxu3 %v1692_v7 }
 0x76c   :  { %v449_v20 = vpop.f32.mrf.mxu3 }
 0x76d   :  { %v450_v21 = vadd.f32 %v1735_v16, %v449_v20  ;;  %v198_v20 = vadd.f32 %v1742_v19, %v197_v18 }
 0x76f   :  { %473 = vrot.lane.b32.xlu0 %v450_v21, %s1586_s3  ;;  %v452_v24 = vadd.f32 %v450_v21, %v192_v23 }
 0x771   :  { %v1445_v25 = vmul.f32 -1.442695, %v452_v24 }
 0x773   :  { %1505 = vpow2.f32 %v1445_v25 }
 0x779   :  { %v1506_v26 = vpop.eup %1505 }
 0x77a   :  { %v456_v27 = vadd.f32 1.0, %v1506_v26 }
 0x77c   :  { %1507 = vrcp.f32 %v456_v27  ;;  %v468_v7 = vand.u32 2147483648, %v456_v27  ;;  %vm462_vm15 = vweird.f32 %v456_v27  ;;  %v466_v30 = vand.u32 2147483647, %v456_v27 }
 0x77e   :  { %v469_v32 = vor.u32 1.1754944e-38, %v468_v7  ;;  %vm467_vm2 = vcmp.eq.f32.partialorder %v466_v30, 8.507059e+37 }
 0x782   :  { %v1508_v3 = vpop.eup %1507 }
 0x783   :  { %v458_v4 = vmul.f32 %v1508_v3, %v456_v27  ;;  %vm463_vm14 = vweird.f32 %v1508_v3 }
 0x784   :  { %vm464_vm0 = vmor %vm462_vm15, %vm463_vm14 }
 0x785   :  { %v459_v28 = vsub.f32 1.0, %v458_v4 }
 0x787   :  { %v460_v6 = vmul.f32 %v1508_v3, %v459_v28 }
 0x789   :  { %v461_v29 = vadd.f32 %v1508_v3, %v460_v6 }
 0x78b   :  { %v465_v31 = vsel %vm464_vm0, %v1508_v3, %v461_v29 }
 0x78c   :  { %v470_v34 = vsel %vm467_vm2, %v469_v32, %v465_v31 }
 0x78d   :  { %v483_v39 = vsub.f32 1.0, %v470_v34  ;;  %v489_v41 = vmul.f32 %v470_v34, %v421_v17 }
 0x7e1   :  { %v474_v33 = vpop.permute.xlu0 %473 }
 0x7e2   :  { %v476_v35 = vmul.f32 %v474_v33, %v470_v34 }
 0x7e4   :  { %478 = vrot.lane.b32.xlu1 %v476_v35, %s1586_s3 }
 0x856   :  { %v479_v36 = vpop.permute.xlu1 %478 }
 0x857   :  { %v481_v37 = vadd.f32 %v479_v36, %v192_v23 }
 0x859   :  { %1509 = vtanh.f32 %v481_v37 }
 0x85f   :  { %v1510_v38 = vpop.eup %1509 }
 0x860   :  { %485 = vrot.lane.b32.xlu2 %v1510_v38, %s1587_s18 }
 0x8ba   :  { %v486_v40 = vpop.permute.xlu2 %485 }
 0x8bb   :  { %v488_v42 = vmul.f32 %v486_v40, %v483_v39 }
 0x8bd   :  { %v490_v43 = vadd.f32 %v489_v41, %v488_v42  ;;  %v784_v41 = vld [vmem:[%s2034_s7 + $0x18] sm:$0xff]  ;;  %v783_v42 = vld [vmem:[%s2034_s7 + $0x10] sm:$0xff] }
 0x8bf   :  { %492 = vrot.lane.b32.xlu0 %v490_v43, %s1587_s18 }
 0x931   :  { %v493_v44 = vpop.permute.xlu0 %492 }
 0x932   :  { %496 = vst.msk [vmem:[#allocation3 + $0x18] sm:$0xff] %vm140_vm1, %v493_v44  ;;  %1446 = vmatmul.msk.f32.vlgmr.msra.gmra.mxu2 %vm140_vm1, %v493_v44  ;;  %v781_v44 = vld [vmem:[%s2034_s7] sm:$0xff] }
 0x933   :  { %825 = vmatpush.msra.mxu2 %v784_v41 }
 0x935   :  { %826 = vmatpush.msra.mxu2 %v783_v42 }
 0x9b5   :  { %v518_v45 = vpop.f32.mrf.mxu2 }
 0x9b6   :  { %v519_v46 = vadd.f32 %v1735_v16, %v518_v45 }
 0x9b8   :  { %542 = vrot.lane.b32.xlu1 %v519_v46, %s1586_s3  ;;  %v521_v49 = vadd.f32 %v519_v46, %v195_v48  ;;  %v773_v46 = vld [vmem:[#allocation3] sm:$0xff] }
 0x9ba   :  { %v1447_v50 = vmul.f32 -1.442695, %v521_v49  ;;  %v776_v49 = vld [vmem:[#allocation3 + $0x18] sm:$0xff] }
 0x9bc   :  { %1511 = vpow2.f32 %v1447_v50 }
 0x9c2   :  { %v1512_v51 = vpop.eup %1511 }
 0x9c3   :  { %v525_v52 = vadd.f32 1.0, %v1512_v51 }
 0x9c5   :  { %1513 = vrcp.f32 %v525_v52  ;;  %v537_v12 = vand.u32 2147483648, %v525_v52  ;;  %vm531_vm4 = vweird.f32 %v525_v52  ;;  %v535_v58 = vand.u32 2147483647, %v525_v52 }
 0x9c7   :  { %v538_v60 = vor.u32 1.1754944e-38, %v537_v12  ;;  %vm536_vm6 = vcmp.eq.f32.partialorder %v535_v58, 8.507059e+37 }
 0x9cb   :  { %v1514_v53 = vpop.eup %1513 }
 0x9cc   :  { %v527_v54 = vmul.f32 %v1514_v53, %v525_v52  ;;  %vm532_vm3 = vweird.f32 %v1514_v53 }
 0x9cd   :  { %vm533_vm5 = vmor %vm531_vm4, %vm532_vm3 }
 0x9ce   :  { %v528_v55 = vsub.f32 1.0, %v527_v54  ;;  %v200_v54 = vpop.f32.mrf.mxu1 }
 0x9d0   :  { %v529_v56 = vmul.f32 %v1514_v53, %v528_v55  ;;  %v201_v55 = vadd.f32 %v1742_v19, %v200_v54 }
 0x9d2   :  { %v530_v57 = vadd.f32 %v1514_v53, %v529_v56 }
 0x9d4   :  { %v534_v59 = vsel %vm533_vm5, %v1514_v53, %v530_v57 }
 0x9d5   :  { %v539_v62 = vsel %vm536_vm6, %v538_v60, %v534_v59 }
 0x9d6   :  { %v552_v5 = vsub.f32 1.0, %v539_v62  ;;  %v558_v10 = vmul.f32 %v539_v62, %v490_v43  ;;  %v782_v43 = vld [vmem:[%s2034_s7 + $0x8] sm:$0xff] }
 0x9d7   :  { %827 = vmatpush.msra.mxu2 %v782_v43 }
 0x9d9   :  { %828 = vmatpush.msra.mxu2 %v781_v44 }
 0xa2a   :  { %v543_v61 = vpop.permute.xlu1 %542 }
 0xa2b   :  { %v545_v63 = vmul.f32 %v543_v61, %v539_v62 }
 0xa2d   :  { %547 = vrot.lane.b32.xlu2 %v545_v63, %s1586_s3 }
 0xa87   :  { %v548_v0 = vpop.permute.xlu2 %547 }
 0xa88   :  { %v550_v1 = vadd.f32 %v548_v0, %v195_v48  ;;  %v775_v48 = vld [vmem:[#allocation3 + $0x10] sm:$0xff] }
 0xa8a   :  { %1515 = vtanh.f32 %v550_v1 }
 0xa90   :  { %v1516_v2 = vpop.eup %1515 }
 0xa91   :  { %554 = vrot.lane.b32.xlu0 %v1516_v2, %s1587_s18 }
 0xb03   :  { %v555_v9 = vpop.permute.xlu0 %554 }
 0xb04   :  { %v557_v11 = vmul.f32 %v555_v9, %v552_v5 }
 0xb06   :  { %v559_v13 = vadd.f32 %v558_v10, %v557_v11 }
 0xb08   :  { %561 = vrot.lane.b32.xlu1 %v559_v13, %s1587_s18 }
 0xb7a   :  { %v562_v14 = vpop.permute.xlu1 %561 }
 0xb7b   :  { %565 = vst.msk [vmem:[#allocation3 + $0x20] sm:$0xff] %vm140_vm1, %v562_v14  ;;  %1448 = vmatmul.msk.f32.vlgmr.msrb.gmra.mxu3 %vm140_vm1, %v562_v14 }
 0xb82   :  { %v777_v50 = vld [vmem:[#allocation3 + $0x20] sm:$0xff] }
 0xbfe   :  { %v587_v15 = vpop.f32.mrf.mxu3 }
 0xbff   :  { %v588_v17 = vadd.f32 %v1735_v16, %v587_v15 }
 0xc01   :  { %611 = vrot.lane.b32.xlu2 %v588_v17, %s1586_s3  ;;  %v590_v21 = vadd.f32 %v588_v17, %v198_v20 }
 0xc03   :  { %v1449_v22 = vmul.f32 -1.442695, %v590_v21  ;;  %v1870_v21 = vld [vmem:[%s2036_s8 + $0x18] sm:$0xff] }
 0xc04   :  { %883 = vmatpush.msrb.mxu3 %v1870_v21  ;;  %1143 = vmatpush.msra.mxu0 %v1870_v21 }
 0xc05   :  { %1517 = vpow2.f32 %v1449_v22  ;;  %v1875_v22 = vld [vmem:[%s2036_s8 + $0x10] sm:$0xff]  ;;  %1208 = vmatpush.msrb.mxu1 %v1870_v21 }
 0xc06   :  { %884 = vmatpush.msrb.mxu3 %v1875_v22  ;;  %1144 = vmatpush.msra.mxu0 %v1875_v22 }
 0xc07   :  { %1209 = vmatpush.msrb.mxu1 %v1875_v22 }
 0xc0b   :  { %v1518_v23 = vpop.eup %1517 }
 0xc0c   :  { %v594_v24 = vadd.f32 1.0, %v1518_v23  ;;  %v1882_v23 = vld [vmem:[%s2036_s8 + $0x8] sm:$0xff] }
 0xc0d   :  { %885 = vmatpush.msrb.mxu3 %v1882_v23  ;;  %1145 = vmatpush.msra.mxu0 %v1882_v23 }
 0xc0e   :  { %1519 = vrcp.f32 %v594_v24  ;;  %v606_v28 = vand.u32 2147483648, %v594_v24  ;;  %vm600_vm8 = vweird.f32 %v594_v24  ;;  %v604_v6 = vand.u32 2147483647, %v594_v24  ;;  %1210 = vmatpush.msrb.mxu1 %v1882_v23 }
 0xc10   :  { %v607_v7 = vor.u32 1.1754944e-38, %v606_v28  ;;  %vm605_vm10 = vcmp.eq.f32.partialorder %v604_v6, 8.507059e+37 }
 0xc14   :  { %v1520_v25 = vpop.eup %1519 }
 0xc15   :  { %v596_v26 = vmul.f32 %v1520_v25, %v594_v24  ;;  %vm601_vm7 = vweird.f32 %v1520_v25  ;;  %v1890_v24 = vld [vmem:[%s2036_s8] sm:$0xff] }
 0xc16   :  { %vm602_vm9 = vmor %vm600_vm8, %vm601_vm7  ;;  %886 = vmatpush.msrb.mxu3 %v1890_v24  ;;  %1146 = vmatpush.msra.mxu0 %v1890_v24 }
 0xc17   :  { %v597_v27 = vsub.f32 1.0, %v596_v26  ;;  %1211 = vmatpush.msrb.mxu1 %v1890_v24 }
 0xc18   :  { %1338 = vmatpush.msrb.mxu0 %v1870_v21 }
 0xc19   :  { %v598_v3 = vmul.f32 %v1520_v25, %v597_v27 }
 0xc1a   :  { %1339 = vmatpush.msrb.mxu0 %v1875_v22 }
 0xc1b   :  { %v599_v4 = vadd.f32 %v1520_v25, %v598_v3  ;;  %v1920_v3 = vld [vmem:[%s2037_s10] ss:$0 sm:$0xff] }
 0xc1c   :  { %1340 = vmatpush.msrb.mxu0 %v1882_v23 }
 0xc1d   :  { %v603_v29 = vsel %vm602_vm9, %v1520_v25, %v599_v4 }
 0xc1e   :  { %v608_v31 = vsel %vm605_vm10, %v607_v7, %v603_v29  ;;  %1341 = vmatpush.msrb.mxu0 %v1890_v24 }
 0xc1f   :  { %v621_v36 = vsub.f32 1.0, %v608_v31  ;;  %v627_v38 = vmul.f32 %v608_v31, %v559_v13 }
 0xc5b   :  { %v612_v30 = vpop.permute.xlu2 %611 }
 0xc5c   :  { %v614_v32 = vmul.f32 %v612_v30, %v608_v31 }
 0xc5e   :  { %616 = vrot.lane.b32.xlu0 %v614_v32, %s1586_s3 }
 0xcd0   :  { %v617_v33 = vpop.permute.xlu0 %616 }
 0xcd1   :  { %v619_v34 = vadd.f32 %v617_v33, %v198_v20 }
 0xcd3   :  { %1521 = vtanh.f32 %v619_v34 }
 0xcd9   :  { %v1522_v35 = vpop.eup %1521 }
 0xcda   :  { %623 = vrot.lane.b32.xlu1 %v1522_v35, %s1587_s18 }
 0xd4c   :  { %v624_v37 = vpop.permute.xlu1 %623 }
 0xd4d   :  { %v626_v39 = vmul.f32 %v624_v37, %v621_v36 }
 0xd4f   :  { %v628_v40 = vadd.f32 %v627_v38, %v626_v39 }
 0xd51   :  { %630 = vrot.lane.b32.xlu2 %v628_v40, %s1587_s18 }
 0xdab   :  { %v631_v45 = vpop.permute.xlu2 %630 }
 0xdac   :  { %634 = vst.msk [vmem:[#allocation3 + $0x28] sm:$0xff] %vm140_vm1, %v631_v45  ;;  %1450 = vmatmul.msk.f32.vlgmr.msrb.gmra.mxu2 %vm140_vm1, %v631_v45 }
 0xdb3   :  { %v778_v51 = vld [vmem:[#allocation3 + $0x28] sm:$0xff] }
 0xdb4   :  { %1454 = vmatmul.msk.f32.vlgmr.msra.gmra.mxu2 %vm140_vm1, %v773_v46 }
 0xdbc   :  { %1455 = vmatmul.msk.f32.gmra.mxu2 %vm140_vm1, %v774_v47 }
 0xdc4   :  { %1456 = vmatmul.msk.f32.gmra.mxu2 %vm140_vm1, %v775_v48 }
 0xdcc   :  { %1457 = vmatmul.msk.f32.gmra.mxu2 %vm140_vm1, %v776_v49 }
 0xdd4   :  { %1458 = vmatmul.msk.f32.gmra.mxu2 %vm140_vm1, %v777_v50 }
 0xddc   :  { %1459 = vmatmul.msk.f32.gmra.mxu2 %vm140_vm1, %v778_v51 }
 0xe2f   :  { %v656_v52 = vpop.f32.mrf.mxu2 }
 0xe30   :  { %v657_v53 = vadd.f32 %v1735_v16, %v656_v52 }
 0xe32   :  { %680 = vrot.lane.b32.xlu0 %v657_v53, %s1586_s3  ;;  %v659_v56 = vadd.f32 %v657_v53, %v201_v55 }
 0xe34   :  { %v1451_v57 = vmul.f32 -1.442695, %v659_v56 }
 0xe36   :  { %1523 = vpow2.f32 %v1451_v57 }
 0xe37   :  { %v830_v6 = vpop.f32.mrf.mxu2 }
 0xe3c   :  { %v1524_v12 = vpop.eup %1523 }
 0xe3d   :  { %v663_v58 = vadd.f32 1.0, %v1524_v12 }
 0xe3f   :  { %1525 = vrcp.f32 %v663_v58  ;;  %v675_v0 = vand.u32 2147483648, %v663_v58  ;;  %vm669_vm12 = vweird.f32 %v663_v58  ;;  %v673_v16 = vand.u32 2147483647, %v663_v58  ;;  %v833_v56 = vpop.f32.mrf.mxu2 }
 0xe41   :  { %v676_v2 = vor.u32 1.1754944e-38, %v675_v0  ;;  %vm674_vm14 = vcmp.eq.f32.partialorder %v673_v16, 8.507059e+37 }
 0xe45   :  { %v1526_v59 = vpop.eup %1525 }
 0xe46   :  { %v665_v60 = vmul.f32 %v1526_v59, %v663_v58  ;;  %vm670_vm11 = vweird.f32 %v1526_v59 }
 0xe47   :  { %vm671_vm13 = vmor %vm669_vm12, %vm670_vm11 }
 0xe48   :  { %v666_v61 = vsub.f32 1.0, %v665_v60 }
 0xe4a   :  { %v667_v62 = vmul.f32 %v1526_v59, %v666_v61 }
 0xe4c   :  { %v668_v63 = vadd.f32 %v1526_v59, %v667_v62 }
 0xe4e   :  { %v672_v1 = vsel %vm671_vm13, %v1526_v59, %v668_v63 }
 0xe4f   :  { %v677_v5 = vsel %vm674_vm14, %v676_v2, %v672_v1 }
 0xe50   :  { %v690_v14 = vsub.f32 1.0, %v677_v5  ;;  %v696_v17 = vmul.f32 %v677_v5, %v628_v40 }
 0xea4   :  { %v681_v19 = vpop.permute.xlu0 %680 }
 0xea5   :  { %v683_v9 = vmul.f32 %v681_v19, %v677_v5 }
 0xea7   :  { %685 = vrot.lane.b32.xlu1 %v683_v9, %s1586_s3 }
 0xf19   :  { %v686_v10 = vpop.permute.xlu1 %685 }
 0xf1a   :  { %v688_v11 = vadd.f32 %v686_v10, %v201_v55 }
 0xf1c   :  { %1527 = vtanh.f32 %v688_v11 }
 0xf22   :  { %v1528_v13 = vpop.eup %1527 }
 0xf23   :  { %692 = vrot.lane.b32.xlu2 %v1528_v13, %s1587_s18 }
 0xf7d   :  { %v693_v15 = vpop.permute.xlu2 %692 }
 0xf7e   :  { %v695_v18 = vmul.f32 %v693_v15, %v690_v14 }
 0xf80   :  { %v1863_v20 = vadd.f32 %v696_v17, %v695_v18 }
 0xf82   :  { %699 = vrot.lane.b32.xlu0 %v1863_v20, %s1587_s18 }
 0xff4   :  { %v700_v25 = vpop.permute.xlu0 %699 }
 0xff5   :  { %703 = vst.msk [vmem:[#allocation3 + $0x30] sm:$0xff] %vm140_vm1, %v700_v25  ;;  %1452 = vmatmul.msk.f32.vlgmr.msra.gmra.mxu3 %vm140_vm1, %v700_v25 }
 0xff6   :  { %948 = vmatpush.msra.mxu3 %v1870_v21 }
 0xff8   :  { %949 = vmatpush.msra.mxu3 %v1875_v22 }
 0xffa   :  { %950 = vmatpush.msra.mxu3 %v1882_v23 }
 0xffc   :  { %v779_v26 = vld [vmem:[#allocation3 + $0x30] sm:$0xff]  ;;  %951 = vmatpush.msra.mxu3 %v1890_v24 }
 0xffd   :  { %1460 = vmatmul.msk.f32.gmra.mxu2 %vm140_vm1, %v779_v26  ;;  %887 = vmatmul.f32.vlgmr.msrb.gmra.mxu3 %v1585_v8  ;;  %v1927_v8 = vld [vmem:[%s2035_s9] ss:$0 sm:$0xff] }
 0xffe   :  { %1013 = vmatpush.msrb.mxu3 %v1870_v21  ;;  %v831_v29 = vadd.f32 %v1927_v8, %v830_v6  ;;  %v834_v57 = vadd.f32 %v1927_v8, %v833_v56 }
0x1000   :  { %1014 = vmatpush.msrb.mxu3 %v1875_v22 }
0x1002   :  { %1015 = vmatpush.msrb.mxu3 %v1882_v23 }
0x1004   :  { %1016 = vmatpush.msrb.mxu3 %v1890_v24 }
0x1078   :  { %v1915_v27 = vpop.f32.mrf.mxu3 }
0x1080   :  { %v888_v4 = vpop.f32.mrf.mxu3 }
0x1081   :  { %v889_v28 = vadd.f32 %v1920_v3, %v888_v4 }
0x1083   :  { %912 = vrot.lane.b32.xlu1 %v889_v28, %s1586_s3  ;;  %v891_v7 = vadd.f32 %v889_v28, %v831_v29 }
0x1085   :  { %v1462_v30 = vmul.f32 -1.442695, %v891_v7  ;;  %v836_v7 = vpop.f32.mrf.mxu2 }
0x1087   :  { %1529 = vpow2.f32 %v1462_v30  ;;  %v837_v30 = vadd.f32 %v1927_v8, %v836_v7 }
0x108d   :  { %v1530_v31 = vpop.eup %1529 }
0x108e   :  { %v895_v32 = vadd.f32 1.0, %v1530_v31 }
0x1090   :  { %1531 = vrcp.f32 %v895_v32  ;;  %v907_v38 = vand.u32 2147483648, %v895_v32  ;;  %vm901_vm0 = vweird.f32 %v895_v32  ;;  %v905_v39 = vand.u32 2147483647, %v895_v32 }
0x1092   :  { %v908_v41 = vor.u32 1.1754944e-38, %v907_v38  ;;  %vm906_vm3 = vcmp.eq.f32.partialorder %v905_v39, 8.507059e+37 }
0x1096   :  { %v1532_v33 = vpop.eup %1531 }
0x1097   :  { %v897_v34 = vmul.f32 %v1532_v33, %v895_v32  ;;  %vm902_vm15 = vweird.f32 %v1532_v33 }
0x1098   :  { %vm903_vm2 = vmor %vm901_vm0, %vm902_vm15 }
0x1099   :  { %v898_v35 = vsub.f32 1.0, %v897_v34 }
0x109b   :  { %v899_v36 = vmul.f32 %v1532_v33, %v898_v35 }
0x109d   :  { %v900_v37 = vadd.f32 %v1532_v33, %v899_v36 }
0x109f   :  { %v904_v40 = vsel %vm903_vm2, %v1532_v33, %v900_v37 }
0x10a0   :  { %v909_v43 = vsel %vm906_vm3, %v908_v41, %v904_v40 }
0x10a1   :  { %v922_v48 = vsub.f32 1.0, %v909_v43  ;;  %v928_v50 = vmul.f32 0.0, %v909_v43 }
0x10f5   :  { %v913_v42 = vpop.permute.xlu1 %912 }
0x10f6   :  { %v915_v44 = vmul.f32 %v913_v42, %v909_v43 }
0x10f8   :  { %917 = vrot.lane.b32.xlu2 %v915_v44, %s1586_s3 }
0x1152   :  { %v918_v45 = vpop.permute.xlu2 %917 }
0x1153   :  { %v920_v46 = vadd.f32 %v918_v45, %v831_v29 }
0x1155   :  { %1533 = vtanh.f32 %v920_v46 }
0x115b   :  { %v1534_v47 = vpop.eup %1533 }
0x115c   :  { %924 = vrot.lane.b32.xlu0 %v1534_v47, %s1587_s18 }
0x11ce   :  { %v925_v49 = vpop.permute.xlu0 %924 }
0x11cf   :  { %v927_v51 = vmul.f32 %v925_v49, %v922_v48 }
0x11d1   :  { %v929_v52 = vadd.f32 %v928_v50, %v927_v51 }
0x11d3   :  { %932 = vrot.lane.b32.xlu1 %v929_v52, %s1587_s18 }
0x1245   :  { %v933_v53 = vpop.permute.xlu1 %932 }
0x1246   :  { %1463 = vmatmul.msk.f32.vlgmr.msra.gmra.mxu3 %vm140_vm1, %v933_v53 }
0x1247   :  { %1078 = vmatpush.msra.mxu3 %v1870_v21 }
0x1249   :  { %1079 = vmatpush.msra.mxu3 %v1875_v22 }
0x124b   :  { %1080 = vmatpush.msra.mxu3 %v1882_v23 }
0x124d   :  { %1081 = vmatpush.msra.mxu3 %v1890_v24 }
0x12c9   :  { %v953_v54 = vpop.f32.mrf.mxu3 }
0x12ca   :  { %v954_v55 = vadd.f32 %v1920_v3, %v953_v54  ;;  %v839_v54 = vpop.f32.mrf.mxu2 }
0x12cc   :  { %977 = vrot.lane.b32.xlu2 %v954_v55, %s1586_s3  ;;  %v956_v12 = vadd.f32 %v954_v55, %v834_v57  ;;  %v840_v55 = vadd.f32 %v1927_v8, %v839_v54 }
0x12ce   :  { %v1464_v58 = vmul.f32 -1.442695, %v956_v12 }
0x12d0   :  { %1535 = vpow2.f32 %v1464_v58 }
0x12d6   :  { %v1536_v59 = vpop.eup %1535 }
0x12d7   :  { %v960_v60 = vadd.f32 1.0, %v1536_v59 }
0x12d9   :  { %1537 = vrcp.f32 %v960_v60  ;;  %v972_v1 = vand.u32 2147483648, %v960_v60  ;;  %vm966_vm5 = vweird.f32 %v960_v60  ;;  %v970_v2 = vand.u32 2147483647, %v960_v60 }
0x12db   :  { %v973_v5 = vor.u32 1.1754944e-38, %v972_v1  ;;  %vm971_vm7 = vcmp.eq.f32.partialorder %v970_v2, 8.507059e+37 }
0x12df   :  { %v1538_v61 = vpop.eup %1537 }
0x12e0   :  { %v962_v62 = vmul.f32 %v1538_v61, %v960_v60  ;;  %vm967_vm4 = vweird.f32 %v1538_v61 }
0x12e1   :  { %vm968_vm6 = vmor %vm966_vm5, %vm967_vm4 }
0x12e2   :  { %v963_v63 = vsub.f32 1.0, %v962_v62 }
0x12e4   :  { %v964_v0 = vmul.f32 %v1538_v61, %v963_v63 }
0x12e6   :  { %v965_v16 = vadd.f32 %v1538_v61, %v964_v0 }
0x12e8   :  { %v969_v19 = vsel %vm968_vm6, %v1538_v61, %v965_v16 }
0x12e9   :  { %v974_v10 = vsel %vm971_vm7, %v973_v5, %v969_v19 }
0x12ea   :  { %v987_v17 = vsub.f32 1.0, %v974_v10  ;;  %v993_v25 = vmul.f32 %v974_v10, %v929_v52 }
0x1326   :  { %v978_v9 = vpop.permute.xlu2 %977 }
0x1327   :  { %v980_v11 = vmul.f32 %v978_v9, %v974_v10 }
0x1329   :  { %982 = vrot.lane.b32.xlu0 %v980_v11, %s1586_s3 }
0x139b   :  { %v983_v13 = vpop.permute.xlu0 %982 }
0x139c   :  { %v985_v14 = vadd.f32 %v983_v13, %v834_v57 }
0x139e   :  { %1539 = vtanh.f32 %v985_v14 }
0x13a4   :  { %v1540_v15 = vpop.eup %1539 }
0x13a5   :  { %989 = vrot.lane.b32.xlu1 %v1540_v15, %s1587_s18 }
0x1417   :  { %v990_v18 = vpop.permute.xlu1 %989 }
0x1418   :  { %v992_v26 = vmul.f32 %v990_v18, %v987_v17 }
0x141a   :  { %v994_v4 = vadd.f32 %v993_v25, %v992_v26 }
0x141c   :  { %997 = vrot.lane.b32.xlu2 %v994_v4, %s1587_s18 }
0x1476   :  { %v998_v28 = vpop.permute.xlu2 %997 }
0x1477   :  { %1465 = vmatmul.msk.f32.vlgmr.msrb.gmra.mxu3 %vm140_vm1, %v998_v28 }
0x1478   :  { %1273 = vmatpush.msrb.mxu3 %v1870_v21 }
0x147a   :  { %1274 = vmatpush.msrb.mxu3 %v1875_v22 }
0x147c   :  { %1275 = vmatpush.msrb.mxu3 %v1882_v23 }
0x147e   :  { %1276 = vmatpush.msrb.mxu3 %v1890_v24 }
0x14fa   :  { %v1018_v6 = vpop.f32.mrf.mxu3 }
0x14fb   :  { %v1019_v29 = vadd.f32 %v1920_v3, %v1018_v6  ;;  %v842_v6 = vpop.f32.mrf.mxu2 }
0x14fd   :  { %1042 = vrot.lane.b32.xlu0 %v1019_v29, %s1586_s3  ;;  %v1021_v31 = vadd.f32 %v1019_v29, %v837_v30  ;;  %v843_v29 = vadd.f32 %v1927_v8, %v842_v6 }
0x14ff   :  { %v1466_v32 = vmul.f32 -1.442695, %v1021_v31 }
0x1501   :  { %1541 = vpow2.f32 %v1466_v32 }
0x1507   :  { %v1542_v33 = vpop.eup %1541 }
0x1508   :  { %v1025_v34 = vadd.f32 1.0, %v1542_v33 }
0x150a   :  { %1543 = vrcp.f32 %v1025_v34  ;;  %v1037_v24 = vand.u32 2147483648, %v1025_v34  ;;  %vm1031_vm9 = vweird.f32 %v1025_v34  ;;  %v1035_v37 = vand.u32 2147483647, %v1025_v34 }
0x150c   :  { %v1038_v39 = vor.u32 1.1754944e-38, %v1037_v24  ;;  %vm1036_vm11 = vcmp.eq.f32.partialorder %v1035_v37, 8.507059e+37 }
0x1510   :  { %v1544_v21 = vpop.eup %1543 }
0x1511   :  { %v1027_v22 = vmul.f32 %v1544_v21, %v1025_v34  ;;  %vm1032_vm8 = vweird.f32 %v1544_v21 }
0x1512   :  { %vm1033_vm10 = vmor %vm1031_vm9, %vm1032_vm8 }
0x1513   :  { %v1028_v35 = vsub.f32 1.0, %v1027_v22 }
0x1515   :  { %v1029_v23 = vmul.f32 %v1544_v21, %v1028_v35 }
0x1517   :  { %v1030_v36 = vadd.f32 %v1544_v21, %v1029_v23 }
0x1519   :  { %v1034_v38 = vsel %vm1033_vm10, %v1544_v21, %v1030_v36 }
0x151a   :  { %v1039_v41 = vsel %vm1036_vm11, %v1038_v39, %v1034_v38 }
0x151b   :  { %v1052_v46 = vsub.f32 1.0, %v1039_v41  ;;  %v1058_v48 = vmul.f32 %v1039_v41, %v994_v4 }
0x156f   :  { %v1043_v40 = vpop.permute.xlu0 %1042 }
0x1570   :  { %v1045_v42 = vmul.f32 %v1043_v40, %v1039_v41 }
0x1572   :  { %1047 = vrot.lane.b32.xlu1 %v1045_v42, %s1586_s3 }
0x15e4   :  { %v1048_v43 = vpop.permute.xlu1 %1047 }
0x15e5   :  { %v1050_v44 = vadd.f32 %v1048_v43, %v837_v30 }
0x15e7   :  { %1545 = vtanh.f32 %v1050_v44 }
0x15ed   :  { %v1546_v45 = vpop.eup %1545 }
0x15ee   :  { %1054 = vrot.lane.b32.xlu2 %v1546_v45, %s1587_s18 }
0x1648   :  { %v1055_v47 = vpop.permute.xlu2 %1054 }
0x1649   :  { %v1057_v49 = vmul.f32 %v1055_v47, %v1052_v46 }
0x164b   :  { %v1059_v50 = vadd.f32 %v1058_v48, %v1057_v49 }
0x164d   :  { %1062 = vrot.lane.b32.xlu0 %v1059_v50, %s1587_s18 }
0x16bf   :  { %v1063_v51 = vpop.permute.xlu0 %1062 }
0x16c0   :  { %1467 = vmatmul.msk.f32.vlgmr.msra.gmra.mxu3 %vm140_vm1, %v1063_v51 }
0x1743   :  { %v1083_v52 = vpop.f32.mrf.mxu3 }
0x1744   :  { %v1084_v53 = vadd.f32 %v1920_v3, %v1083_v52 }
0x1746   :  { %1107 = vrot.lane.b32.xlu1 %v1084_v53, %s1586_s3  ;;  %v1086_v56 = vadd.f32 %v1084_v53, %v840_v55  ;;  %v845_v53 = vpop.f32.mrf.mxu2 }
0x1747   :  { %v846_v54 = vadd.f32 %v1927_v8, %v845_v53 }
0x1748   :  { %v1468_v57 = vmul.f32 -1.442695, %v1086_v56 }
0x174a   :  { %1547 = vpow2.f32 %v1468_v57 }
0x1750   :  { %v1548_v12 = vpop.eup %1547 }
0x1751   :  { %v1090_v58 = vadd.f32 1.0, %v1548_v12 }
0x1753   :  { %1549 = vrcp.f32 %v1090_v58  ;;  %v1102_v0 = vand.u32 2147483648, %v1090_v58  ;;  %vm1096_vm13 = vweird.f32 %v1090_v58  ;;  %v1100_v16 = vand.u32 2147483647, %v1090_v58 }
0x1755   :  { %v1103_v2 = vor.u32 1.1754944e-38, %v1102_v0  ;;  %vm1101_vm15 = vcmp.eq.f32.partialorder %v1100_v16, 8.507059e+37 }
0x1759   :  { %v1550_v59 = vpop.eup %1549 }
0x175a   :  { %v1092_v60 = vmul.f32 %v1550_v59, %v1090_v58  ;;  %vm1097_vm12 = vweird.f32 %v1550_v59 }
0x175b   :  { %vm1098_vm14 = vmor %vm1096_vm13, %vm1097_vm12 }
0x175c   :  { %v1093_v61 = vsub.f32 1.0, %v1092_v60 }
0x175e   :  { %v1094_v62 = vmul.f32 %v1550_v59, %v1093_v61 }
0x1760   :  { %v1095_v63 = vadd.f32 %v1550_v59, %v1094_v62 }
0x1762   :  { %v1099_v1 = vsel %vm1098_vm14, %v1550_v59, %v1095_v63 }
0x1763   :  { %v1104_v5 = vsel %vm1101_vm15, %v1103_v2, %v1099_v1 }
0x1764   :  { %v1117_v14 = vsub.f32 1.0, %v1104_v5  ;;  %v1123_v17 = vmul.f32 %v1104_v5, %v1059_v50  ;;  %v203_v50 = vpop.f32.mrf.mxu1 }
0x17b8   :  { %v1108_v19 = vpop.permute.xlu1 %1107 }
0x17b9   :  { %v1110_v9 = vmul.f32 %v1108_v19, %v1104_v5 }
0x17bb   :  { %1112 = vrot.lane.b32.xlu2 %v1110_v9, %s1586_s3  ;;  %v1583_v9 = vld [vmem:[%s2032_s6] ss:$0 sm:$0xff] }
0x1815   :  { %v1113_v10 = vpop.permute.xlu2 %1112 }
0x1816   :  { %v1115_v11 = vadd.f32 %v1113_v10, %v840_v55  ;;  %v726_v10 = vadd.f32 %v1583_v9, %v1915_v27 }
0x1818   :  { %1551 = vtanh.f32 %v1115_v11 }
0x181e   :  { %v1552_v13 = vpop.eup %1551 }
0x181f   :  { %1119 = vrot.lane.b32.xlu0 %v1552_v13, %s1587_s18 }
0x1891   :  { %v1120_v15 = vpop.permute.xlu0 %1119 }
0x1892   :  { %v1122_v18 = vmul.f32 %v1120_v15, %v1117_v14  ;;  %v1584_v15 = vld [vmem:[%s2033_s5] ss:$0 sm:$0xff] }
0x1894   :  { %v1124_v25 = vadd.f32 %v1123_v17, %v1122_v18  ;;  %v204_v17 = vadd.f32 %v1584_v15, %v203_v50 }
0x1896   :  { %1127 = vrot.lane.b32.xlu1 %v1124_v25, %s1587_s18  ;;  %v728_v18 = vadd.f32 %v726_v10, %v204_v17 }
0x1908   :  { %v1128_v26 = vpop.permute.xlu1 %1127 }
0x1909   :  { %1469 = vmatmul.msk.f32.vlgmr.msra.gmra.mxu0 %vm140_vm1, %v1128_v26 }
0x1986   :  { %v1148_v4 = vpop.f32.mrf.mxu0 }
0x1987   :  { %v1149_v28 = vadd.f32 %v1920_v3, %v1148_v4 }
0x1989   :  { %1172 = vrot.lane.b32.xlu2 %v1149_v28, %s1586_s3  ;;  %v1151_v7 = vadd.f32 %v1149_v28, %v843_v29 }
0x198b   :  { %v1470_v30 = vmul.f32 -1.442695, %v1151_v7 }
0x198d   :  { %1553 = vpow2.f32 %v1470_v30 }
0x1993   :  { %v1554_v31 = vpop.eup %1553 }
0x1994   :  { %v1155_v32 = vadd.f32 1.0, %v1554_v31 }
0x1996   :  { %1555 = vrcp.f32 %v1155_v32  ;;  %v1167_v23 = vand.u32 2147483648, %v1155_v32  ;;  %vm1161_vm2 = vweird.f32 %v1155_v32  ;;  %v1165_v36 = vand.u32 2147483647, %v1155_v32 }
0x1998   :  { %v1168_v37 = vor.u32 1.1754944e-38, %v1167_v23  ;;  %vm1166_vm4 = vcmp.eq.f32.partialorder %v1165_v36, 8.507059e+37 }
0x199c   :  { %v1556_v33 = vpop.eup %1555 }
0x199d   :  { %v1157_v34 = vmul.f32 %v1556_v33, %v1155_v32  ;;  %vm1162_vm0 = vweird.f32 %v1556_v33 }
0x199e   :  { %vm1163_vm3 = vmor %vm1161_vm2, %vm1162_vm0 }
0x199f   :  { %v1158_v21 = vsub.f32 1.0, %v1157_v34 }
0x19a1   :  { %v1159_v22 = vmul.f32 %v1556_v33, %v1158_v21 }
0x19a3   :  { %v1160_v35 = vadd.f32 %v1556_v33, %v1159_v22 }
0x19a5   :  { %v1164_v24 = vsel %vm1163_vm3, %v1556_v33, %v1160_v35 }
0x19a6   :  { %v1169_v39 = vsel %vm1166_vm4, %v1168_v37, %v1164_v24 }
0x19a7   :  { %v1182_v44 = vsub.f32 1.0, %v1169_v39  ;;  %v1188_v46 = vmul.f32 %v1169_v39, %v1124_v25  ;;  %v1453_v25 = vmul.f32 -1.442695, %v728_v18 }
0x19e3   :  { %v1173_v38 = vpop.permute.xlu2 %1172 }
0x19e4   :  { %v1175_v40 = vmul.f32 %v1173_v38, %v1169_v39 }
0x19e6   :  { %1177 = vrot.lane.b32.xlu0 %v1175_v40, %s1586_s3 }
0x1a58   :  { %v1178_v41 = vpop.permute.xlu0 %1177 }
0x1a59   :  { %v1180_v42 = vadd.f32 %v1178_v41, %v843_v29 }
0x1a5b   :  { %1557 = vtanh.f32 %v1180_v42 }
0x1a61   :  { %v1558_v43 = vpop.eup %1557 }
0x1a62   :  { %1184 = vrot.lane.b32.xlu1 %v1558_v43, %s1587_s18 }
0x1ad4   :  { %v1185_v45 = vpop.permute.xlu1 %1184 }
0x1ad5   :  { %v1187_v47 = vmul.f32 %v1185_v45, %v1182_v44  ;;  %v848_v44 = vpop.f32.mrf.mxu2 }
0x1ad6   :  { %v849_v45 = vadd.f32 %v1927_v8, %v848_v44 }
0x1ad7   :  { %v1189_v48 = vadd.f32 %v1188_v46, %v1187_v47 }
0x1ad9   :  { %1192 = vrot.lane.b32.xlu2 %v1189_v48, %s1587_s18 }
0x1b33   :  { %v1193_v49 = vpop.permute.xlu2 %1192 }
0x1b34   :  { %1471 = vmatmul.msk.f32.vlgmr.msrb.gmra.mxu1 %vm140_vm1, %v1193_v49 }
0x1bb1   :  { %v1213_v51 = vpop.f32.mrf.mxu1 }
0x1bb2   :  { %v1214_v52 = vadd.f32 %v1920_v3, %v1213_v51 }
0x1bb4   :  { %1237 = vrot.lane.b32.xlu0 %v1214_v52, %s1586_s3  ;;  %v1216_v55 = vadd.f32 %v1214_v52, %v846_v54 }
0x1bb6   :  { %v1472_v56 = vmul.f32 -1.442695, %v1216_v55 }
0x1bb8   :  { %1559 = vpow2.f32 %v1472_v56 }
0x1bbe   :  { %v1560_v57 = vpop.eup %1559 }
0x1bbf   :  { %v1220_v12 = vadd.f32 1.0, %v1560_v57 }
0x1bc1   :  { %1561 = vrcp.f32 %v1220_v12  ;;  %v1232_v63 = vand.u32 2147483648, %v1220_v12  ;;  %vm1226_vm6 = vweird.f32 %v1220_v12  ;;  %v1230_v0 = vand.u32 2147483647, %v1220_v12 }
0x1bc3   :  { %v1233_v1 = vor.u32 1.1754944e-38, %v1232_v63  ;;  %vm1231_vm8 = vcmp.eq.f32.partialorder %v1230_v0, 8.507059e+37 }
0x1bc7   :  { %v1562_v58 = vpop.eup %1561 }
0x1bc8   :  { %v1222_v59 = vmul.f32 %v1562_v58, %v1220_v12  ;;  %vm1227_vm5 = vweird.f32 %v1562_v58 }
0x1bc9   :  { %vm1228_vm7 = vmor %vm1226_vm6, %vm1227_vm5 }
0x1bca   :  { %v1223_v60 = vsub.f32 1.0, %v1222_v59 }
0x1bcc   :  { %v1224_v61 = vmul.f32 %v1562_v58, %v1223_v60 }
0x1bce   :  { %v1225_v62 = vadd.f32 %v1562_v58, %v1224_v61 }
0x1bd0   :  { %v1229_v16 = vsel %vm1228_vm7, %v1562_v58, %v1225_v62 }
0x1bd1   :  { %v1234_v19 = vsel %vm1231_vm8, %v1233_v1, %v1229_v16 }
0x1bd2   :  { %v1247_v7 = vsub.f32 1.0, %v1234_v19  ;;  %v1253_v31 = vmul.f32 %v1234_v19, %v1189_v48 }
0x1c26   :  { %v1238_v2 = vpop.permute.xlu0 %1237 }
0x1c27   :  { %v1240_v5 = vmul.f32 %v1238_v2, %v1234_v19 }
0x1c29   :  { %1242 = vrot.lane.b32.xlu1 %v1240_v5, %s1586_s3 }
0x1c31   :  { %749 = vrot.lane.b32.xlu1 %v726_v10, %s1586_s3 }
0x1c9b   :  { %v1243_v11 = vpop.permute.xlu1 %1242 }
0x1c9c   :  { %v1245_v13 = vadd.f32 %v1243_v11, %v846_v54 }
0x1c9e   :  { %1563 = vtanh.f32 %v1245_v13 }
0x1c9f   :  { %1565 = vpow2.f32 %v1453_v25 }
0x1ca3   :  { %v750_v36 = vpop.permute.xlu1 %749 }
0x1ca4   :  { %v1564_v14 = vpop.eup %1563 }
0x1ca5   :  { %1249 = vrot.lane.b32.xlu2 %v1564_v14, %s1587_s18  ;;  %v1566_v26 = vpop.eup %1565 }
0x1ca6   :  { %v732_v4 = vadd.f32 1.0, %v1566_v26 }
0x1ca8   :  { %1567 = vrcp.f32 %v732_v4  ;;  %v744_v21 = vand.u32 2147483648, %v732_v4  ;;  %vm738_vm10 = vweird.f32 %v732_v4  ;;  %v742_v22 = vand.u32 2147483647, %v732_v4 }
0x1caa   :  { %v745_v23 = vor.u32 1.1754944e-38, %v744_v21  ;;  %vm743_vm12 = vcmp.eq.f32.partialorder %v742_v22, 8.507059e+37 }
0x1cae   :  { %v1568_v27 = vpop.eup %1567 }
0x1caf   :  { %v734_v28 = vmul.f32 %v1568_v27, %v732_v4  ;;  %vm739_vm9 = vweird.f32 %v1568_v27 }
0x1cb0   :  { %vm740_vm11 = vmor %vm738_vm10, %vm739_vm9 }
0x1cb1   :  { %v735_v6 = vsub.f32 1.0, %v734_v28 }
0x1cb3   :  { %v736_v29 = vmul.f32 %v1568_v27, %v735_v6 }
0x1cb5   :  { %v737_v33 = vadd.f32 %v1568_v27, %v736_v29 }
0x1cb7   :  { %v741_v35 = vsel %vm740_vm11, %v1568_v27, %v737_v33 }
0x1cb8   :  { %v746_v24 = vsel %vm743_vm12, %v745_v23, %v741_v35 }
0x1cb9   :  { %v752_v37 = vmul.f32 %v750_v36, %v746_v24  ;;  %v759_v61 = vsub.f32 1.0, %v746_v24  ;;  %v765_v63 = vmul.f32 %v746_v24, %v1863_v20 }
0x1cff   :  { %v1250_v30 = vpop.permute.xlu2 %1249 }
0x1d00   :  { %v1252_v32 = vmul.f32 %v1250_v30, %v1247_v7 }
0x1d02   :  { %v1983_v34 = vadd.f32 %v1253_v31, %v1252_v32 }
0x1d04   :  { %1257 = vrot.lane.b32.xlu0 %v1983_v34, %s1587_s18 }
0x1d0c   :  { %754 = vrot.lane.b32.xlu0 %v752_v37, %s1586_s3  ;;  %v1388_v37 = vld [vmem:[%s2038_s11 + $0x18] sm:$0xff] }
0x1d0d   :  { %1410 = vmatpush.msra.mxu1 %v1388_v37 }
0x1d76   :  { %v1258_v38 = vpop.permute.xlu0 %1257 }
0x1d77   :  { %1473 = vmatmul.msk.f32.vlgmr.msrb.gmra.mxu3 %vm140_vm1, %v1258_v38  ;;  %v1387_v38 = vld [vmem:[%s2038_s11 + $0x10] sm:$0xff] }
0x1d78   :  { %1411 = vmatpush.msra.mxu1 %v1387_v38 }
0x1d7e   :  { %v755_v39 = vpop.permute.xlu0 %754 }
0x1d7f   :  { %v757_v40 = vadd.f32 %v755_v39, %v204_v17  ;;  %v1386_v39 = vld [vmem:[%s2038_s11 + $0x8] sm:$0xff] }
0x1d80   :  { %1412 = vmatpush.msra.mxu1 %v1386_v39 }
0x1d81   :  { %1569 = vtanh.f32 %v757_v40  ;;  %v1385_v40 = vld [vmem:[%s2038_s11] sm:$0xff] }
0x1d82   :  { %1413 = vmatpush.msra.mxu1 %v1385_v40 }
0x1d87   :  { %v1570_v43 = vpop.eup %1569 }
0x1dfa   :  { %v1278_v41 = vpop.f32.mrf.mxu3 }
0x1dfb   :  { %v1279_v42 = vadd.f32 %v1920_v3, %v1278_v41 }
0x1dfd   :  { %1302 = vrot.lane.b32.xlu2 %v1279_v42, %s1586_s3  ;;  %v1281_v46 = vadd.f32 %v1279_v42, %v849_v45 }
0x1dff   :  { %v1474_v47 = vmul.f32 -1.442695, %v1281_v46 }
0x1e01   :  { %1571 = vpow2.f32 %v1474_v47  ;;  %v1486_v47 = vld [vmem:[%s2039_s12] ss:$0 sm:$0xff] }
0x1e05   :  { %761 = vrot.lane.b32.xlu2 %v1570_v43, %s1587_s18 }
0x1e07   :  { %v1572_v48 = vpop.eup %1571 }
0x1e08   :  { %v1285_v49 = vadd.f32 1.0, %v1572_v48 }
0x1e0a   :  { %1573 = vrcp.f32 %v1285_v49  ;;  %v1297_v55 = vand.u32 2147483648, %v1285_v49  ;;  %vm1291_vm14 = vweird.f32 %v1285_v49  ;;  %v1295_v56 = vand.u32 2147483647, %v1285_v49 }
0x1e0c   :  { %v1298_v12 = vor.u32 1.1754944e-38, %v1297_v55  ;;  %vm1296_vm0 = vcmp.eq.f32.partialorder %v1295_v56, 8.507059e+37 }
0x1e10   :  { %v1574_v50 = vpop.eup %1573 }
0x1e11   :  { %v1287_v51 = vmul.f32 %v1574_v50, %v1285_v49  ;;  %vm1292_vm13 = vweird.f32 %v1574_v50 }
0x1e12   :  { %vm1293_vm15 = vmor %vm1291_vm14, %vm1292_vm13 }
0x1e13   :  { %v1288_v52 = vsub.f32 1.0, %v1287_v51 }
0x1e15   :  { %v1289_v53 = vmul.f32 %v1574_v50, %v1288_v52 }
0x1e17   :  { %v1290_v54 = vadd.f32 %v1574_v50, %v1289_v53 }
0x1e19   :  { %v1294_v57 = vsel %vm1293_vm15, %v1574_v50, %v1290_v54 }
0x1e1a   :  { %v1299_v59 = vsel %vm1296_vm0, %v1298_v12, %v1294_v57 }
0x1e1b   :  { %v1312_v10 = vsub.f32 1.0, %v1299_v59  ;;  %v1318_v20 = vmul.f32 %v1299_v59, %v1983_v34 }
0x1e57   :  { %v1303_v58 = vpop.permute.xlu2 %1302 }
0x1e58   :  { %v1305_v60 = vmul.f32 %v1303_v58, %v1299_v59 }
0x1e5a   :  { %1307 = vrot.lane.b32.xlu1 %v1305_v60, %s1586_s3 }
0x1e5f   :  { %v762_v62 = vpop.permute.xlu2 %761 }
0x1e60   :  { %v764_v0 = vmul.f32 %v762_v62, %v759_v61 }
0x1e62   :  { %v766_v16 = vadd.f32 %v765_v63, %v764_v0 }
0x1e64   :  { %768 = vrot.lane.b32.xlu1 %v766_v16, %s1587_s18 }
0x1ecc   :  { %v1308_v1 = vpop.permute.xlu1 %1307 }
0x1ecd   :  { %v1310_v2 = vadd.f32 %v1308_v1, %v849_v45 }
0x1ecf   :  { %1575 = vtanh.f32 %v1310_v2 }
0x1ed5   :  { %v1576_v19 = vpop.eup %1575 }
0x1ed6   :  { %1314 = vrot.lane.b32.xlu0 %v1576_v19, %s1587_s18  ;;  %v769_v5 = vpop.permute.xlu1 %768 }
0x1ed7   :  { %772 = vst.msk [vmem:[#allocation3 + $0x38] sm:$0xff] %vm140_vm1, %v769_v5 }
0x1ede   :  { %v780_v9 = vld [vmem:[#allocation3 + $0x38] sm:$0xff] }
0x1edf   :  { %1461 = vmatmul.msk.f32.gmra.mxu2 %vm140_vm1, %v780_v9 }
0x1f48   :  { %v1315_v11 = vpop.permute.xlu0 %1314 }
0x1f49   :  { %v1317_v13 = vmul.f32 %v1315_v11, %v1312_v10 }
0x1f4b   :  { %v1319_v14 = vadd.f32 %v1318_v20, %v1317_v13 }
0x1f4d   :  { %1322 = vrot.lane.b32.xlu2 %v1319_v14, %s1587_s18 }
0x1f62   :  { %v851_v25 = vpop.f32.mrf.mxu2 }
0x1f63   :  { %v852_v26 = vadd.f32 %v1927_v8, %v851_v25 }
0x1fa7   :  { %v1323_v15 = vpop.permute.xlu2 %1322 }
0x1fa8   :  { %1475 = vmatmul.msk.f32.vlgmr.msrb.gmra.mxu0 %vm140_vm1, %v1323_v15 }
0x2025   :  { %v1343_v17 = vpop.f32.mrf.mxu0 }
0x2026   :  { %v1344_v18 = vadd.f32 %v1920_v3, %v1343_v17 }
0x2028   :  { %1367 = vrot.lane.b32.xlu0 %v1344_v18, %s1586_s3  ;;  %v1346_v4 = vadd.f32 %v1344_v18, %v852_v26 }
0x202a   :  { %v1476_v27 = vmul.f32 -1.442695, %v1346_v4 }
0x202c   :  { %1577 = vpow2.f32 %v1476_v27 }
0x2032   :  { %v1578_v28 = vpop.eup %1577 }
0x2033   :  { %v1350_v6 = vadd.f32 1.0, %v1578_v28 }
0x2035   :  { %1579 = vrcp.f32 %v1350_v6  ;;  %v1362_v33 = vand.u32 2147483648, %v1350_v6  ;;  %vm1356_vm3 = vweird.f32 %v1350_v6  ;;  %v1360_v3 = vand.u32 2147483647, %v1350_v6 }
0x2037   :  { %v1363_v21 = vor.u32 1.1754944e-38, %v1362_v33  ;;  %vm1361_vm5 = vcmp.eq.f32.partialorder %v1360_v3, 8.507059e+37 }
0x203b   :  { %v1580_v29 = vpop.eup %1579 }
0x203c   :  { %v1352_v7 = vmul.f32 %v1580_v29, %v1350_v6  ;;  %vm1357_vm2 = vweird.f32 %v1580_v29 }
0x203d   :  { %vm1358_vm4 = vmor %vm1356_vm3, %vm1357_vm2 }
0x203e   :  { %v1353_v30 = vsub.f32 1.0, %v1352_v7 }
0x2040   :  { %v1354_v31 = vmul.f32 %v1580_v29, %v1353_v30 }
0x2042   :  { %v1355_v32 = vadd.f32 %v1580_v29, %v1354_v31 }
0x2044   :  { %v1359_v34 = vsel %vm1358_vm4, %v1580_v29, %v1355_v32 }
0x2045   :  { %v1364_v22 = vsel %vm1361_vm5, %v1363_v21, %v1359_v34 }
0x2046   :  { %v1377_v41 = vsub.f32 1.0, %v1364_v22  ;;  %v1383_v43 = vmul.f32 %v1364_v22, %v1319_v14 }
0x209a   :  { %v1368_v8 = vpop.permute.xlu0 %1367 }
0x209b   :  { %v1370_v35 = vmul.f32 %v1368_v8, %v1364_v22 }
0x209d   :  { %1372 = vrot.lane.b32.xlu1 %v1370_v35, %s1586_s3 }
0x210f   :  { %v1373_v23 = vpop.permute.xlu1 %1372 }
0x2110   :  { %v1375_v36 = vadd.f32 %v1373_v23, %v852_v26 }
0x2112   :  { %1581 = vtanh.f32 %v1375_v36 }
0x2118   :  { %v1582_v24 = vpop.eup %1581 }
0x2119   :  { %1379 = vrot.lane.b32.xlu2 %v1582_v24, %s1587_s18 }
0x2173   :  { %v1380_v42 = vpop.permute.xlu2 %1379 }
0x2174   :  { %v1382_v44 = vmul.f32 %v1380_v42, %v1377_v41 }
0x2176   :  { %v1384_v45 = vadd.f32 %v1383_v43, %v1382_v44 }
0x2178   :  { %1394 = vrot.lane.b32.xlu0 %v1384_v45, %s1587_s18 }
0x21ea   :  { %v1395_v46 = vpop.permute.xlu0 %1394 }
0x21eb   :  { %1477 = vmatmul.msk.f32.vlgmr.msra.gmra.mxu1 %vm140_vm1, %v1395_v46 }
0x2268   :  { %v1415_v48 = vpop.f32.mrf.mxu1 }
0x2269   :  { %v1416_v49 = vadd.f32 %v1486_v47, %v1415_v48 }
0x226b   :  { %1418 = vst [vmem:[%s2040_s13] sm:$0xff] %v1416_v49 }

</bundles_post_ra>
